<compile_context>
chip_gen: v7x
topology: tpu7x:2x2x1
jax: 0.10.0
libtpu: 0.0.40
codegen_flags: <defaults>
</compile_context>

<pallas_src>
import functools

import jax
import jax.numpy as jnp
from jax import lax
from jax.experimental import pallas as pl
from jax.experimental.pallas import tpu as pltpu

_GRAY_COEFFS = (65.738 / 256.0, 129.057 / 256.0, 25.064 / 256.0)


def _vertical_diff_operator(h):
    # (dv @ g)[i, j] = g[i+1, j] - g[i-1, j]   (zero padding at the borders)
    a = jnp.arange(h)[:, None]
    b = jnp.arange(h)[None, :]
    return (jnp.where(b == a + 1, 1.0, 0.0)
            - jnp.where(b == a - 1, 1.0, 0.0)).astype(jnp.float32)


def _horizontal_diff_operator(w):
    # (g @ mh)[i, j] = g[i, j+1] - g[i, j-1]   (zero padding at the borders)
    k = jnp.arange(w)[:, None]
    j = jnp.arange(w)[None, :]
    return (jnp.where(k == j + 1, 1.0, 0.0)
            - jnp.where(k == j - 1, 1.0, 0.0)).astype(jnp.float32)


def _grad_loss_kernel(*refs, B, C, H, W, denom, roll_v, roll_h, cache):
    it = iter(refs)
    x_ref = next(it)
    y_ref = next(it)
    dv_ref = next(it) if not roll_v else None
    mh_ref = next(it) if not roll_h else None
    loss_ref = next(it)
    stats_ref = next(it)            # (1, 8): [xmin, xmax, ymin, ymax, acc, ...]
    mxc_ref = next(it) if cache else None
    myc_ref = next(it) if cache else None

    p = pl.program_id(0)            # 0: global min/max pass, 1: L1 pass
    i = pl.program_id(1)            # image-block index
    last_i = pl.num_programs(1) - 1

    # Border masks: built once per grid step, shared by both tensors and every
    # image in the block (hoisted out of magnitude()).
    if roll_v:
        row = lax.broadcasted_iota(jnp.int32, (H, W), 0)
        v_hi_ok = row < (H - 1)
        v_lo_ok = row > 0
    if roll_h:
        col = lax.broadcasted_iota(jnp.int32, (H, W), 1)
        h_hi_ok = col < (W - 1)
        h_lo_ok = col > 0

    def gray(img_ref, b):
        # One image of the block, cast to f32 in-kernel (inputs stay native).
        if C == 3:
            return (img_ref[b, 0].astype(jnp.float32) * _GRAY_COEFFS[0]
                    + img_ref[b, 1].astype(jnp.float32) * _GRAY_COEFFS[1]
                    + img_ref[b, 2].astype(jnp.float32) * _GRAY_COEFFS[2])
        return img_ref[b, 0].astype(jnp.float32)

    def magnitude(g):
        # Zero-padded +/-1 shift differences along each axis.
        if roll_v:
            up = pltpu.roll(g, H - 1, axis=0)     # up[r] = g[(r+1) % H]
            dn = pltpu.roll(g, 1, axis=0)         # dn[r] = g[(r-1) % H]
            x_v = jnp.where(v_hi_ok, up, 0.0) - jnp.where(v_lo_ok, dn, 0.0)
        else:
            x_v = jnp.dot(dv_ref[...], g, preferred_element_type=jnp.float32)
        if roll_h:
            rt = pltpu.roll(g, W - 1, axis=1)     # rt[:, c] = g[:, (c+1) % W]
            lt = pltpu.roll(g, 1, axis=1)         # lt[:, c] = g[:, (c-1) % W]
            x_h = jnp.where(h_hi_ok, rt, 0.0) - jnp.where(h_lo_ok, lt, 0.0)
        else:
            x_h = jnp.dot(g, mh_ref[...], preferred_element_type=jnp.float32)
        return jnp.sqrt(x_v * x_v + x_h * x_h + 1e-6)

    @pl.when(jnp.logical_and(p == 0, i == 0))
    def _init():
        lane = lax.broadcasted_iota(jnp.int32, (1, 8), 1)
        big = float(jnp.finfo(jnp.float32).max)
        init = jnp.where((lane == 0) | (lane == 2), big,
                         jnp.where((lane == 1) | (lane == 3), -big, 0.0))
        stats_ref[...] = init.astype(jnp.float32)

    @pl.when(p == 0)
    def _minmax_pass():
        a_min = a_max = b_min = b_max = None
        for b in range(B):
            ma = magnitude(gray(x_ref, b))
            mb = magnitude(gray(y_ref, b))
            if cache:
                gi = i * B + b
                mxc_ref[gi] = ma
                myc_ref[gi] = mb
            i_amin = jnp.min(ma, keepdims=True)
            i_amax = jnp.max(ma, keepdims=True)
            i_bmin = jnp.min(mb, keepdims=True)
            i_bmax = jnp.max(mb, keepdims=True)
            if a_min is None:
                a_min, a_max, b_min, b_max = i_amin, i_amax, i_bmin, i_bmax
            else:
                a_min = jnp.minimum(a_min, i_amin)
                a_max = jnp.maximum(a_max, i_amax)
                b_min = jnp.minimum(b_min, i_bmin)
                b_max = jnp.maximum(b_max, i_bmax)
        stats_ref[0:1, 0:1] = jnp.minimum(stats_ref[0:1, 0:1], a_min)
        stats_ref[0:1, 1:2] = jnp.maximum(stats_ref[0:1, 1:2], a_max)
        stats_ref[0:1, 2:3] = jnp.minimum(stats_ref[0:1, 2:3], b_min)
        stats_ref[0:1, 3:4] = jnp.maximum(stats_ref[0:1, 3:4], b_max)

    @pl.when(p == 1)
    def _l1_pass():
        xmin = stats_ref[0:1, 0:1]
        xmax = stats_ref[0:1, 1:2]
        ymin = stats_ref[0:1, 2:3]
        ymax = stats_ref[0:1, 3:4]
        # ((g-min)/range - 0.5)*2  ->  g*inv_r + offset; offsets folded into
        # `const` so the per-pixel work is two muls + adds (no divides).
        # approx=False: computed once per step on a (1,1), exactness is free.
        inv_ra = 2.0 * pl.reciprocal(xmax - xmin + 1e-6, approx=False)
        inv_rb = 2.0 * pl.reciprocal(ymax - ymin + 1e-6, approx=False)
        const = ymin * inv_rb - xmin * inv_ra
        blk_sum = jnp.zeros((1, 1), jnp.float32)
        for b in range(B):
            if cache:
                gi = i * B + b
                ma = mxc_ref[gi]
                mb = myc_ref[gi]
            else:
                ma = magnitude(gray(x_ref, b))
                mb = magnitude(gray(y_ref, b))
            diff = jnp.abs(ma * inv_ra - mb * inv_rb + const)
            blk_sum = blk_sum + jnp.sum(diff, keepdims=True)
        stats_ref[0:1, 4:5] += blk_sum

    @pl.when(jnp.logical_and(p == 1, i == last_i))
    def _finalize():
        loss_ref[...] = (stats_ref[0:1, 4:5] * (1.0 / denom)).astype(loss_ref.dtype)


def _vmem_limit_bytes():
    """Generation-aware scoped-VMEM limit (v5e/v6e: 128 MiB, v7x: 64 MiB phys)."""
    cap = 64 * 1024 * 1024
    try:
        cap = int(pltpu.get_tpu_info().vmem_capacity_bytes)
    except Exception:
        pass
    return int(min(cap * 3 // 4, 100 * 1024 * 1024))


def grad_loss(output, gt_img):
    """Pallas implementation of GradLoss.forward (NCHW inputs, C in {1, 3})."""
    n, c, h, w = output.shape
    assert gt_img.shape == output.shape
    assert c in (1, 3)

    roll_v = (h % 8 == 0)        # sublane rolls when the H axis is tile-friendly
    roll_h = (w % 128 == 0)      # lane rolls when the W axis is tile-friendly

    itemsize = jnp.dtype(output.dtype).itemsize
    vmem_limit = _vmem_limit_bytes()

    # --- image packing: B images per grid step (amortize ~0.35us step cost) ---
    per_img_in_bytes = c * h * w * itemsize
    blk_target = 8 * 1024 * 1024
    B = 1
    for d in range(1, n + 1):
        if n % d == 0 and d <= 16 and \
                d * per_img_in_bytes <= max(blk_target, per_img_in_bytes):
            B = d
    nb = n // B

    # --- pass-1 magnitude cache (skip re-read + recompute) when it fits VMEM ---
    pipeline_bytes = 2 * 2 * B * per_img_in_bytes       # 2 inputs, double buffered
    op_bytes = (0 if roll_v else 2 * h * h * 4) + (0 if roll_h else 2 * w * w * 4)
    cache_bytes = 2 * n * h * w * 4
    cache = (c == 3) and \
            (cache_bytes + pipeline_bytes + op_bytes + (4 << 20) <= vmem_limit)

    if cache:
        # In pass 1 the kernel only reads the VMEM cache; collapsing the image
        # block index to 0 makes the pipeline skip all pass-1 input DMAs.
        img_index = lambda p, i: (i * (1 - p), 0, 0, 0)
    else:
        img_index = lambda p, i: (i, 0, 0, 0)
    img_spec = pl.BlockSpec((B, c, h, w), img_index)

    operands = [output, gt_img]
    in_specs = [img_spec, img_spec]
    if not roll_v:
        operands.append(_vertical_diff_operator(h))
        in_specs.append(pl.BlockSpec((h, h), lambda p, i: (0, 0)))
    if not roll_h:
        operands.append(_horizontal_diff_operator(w))
        in_specs.append(pl.BlockSpec((w, w), lambda p, i: (0, 0)))

    scratch_shapes = [pltpu.VMEM((1, 8), jnp.float32)]  # min/max/acc stats
    if cache:
        scratch_shapes += [pltpu.VMEM((n, h, w), jnp.float32),
                           pltpu.VMEM((n, h, w), jnp.float32)]

    kernel = functools.partial(
        _grad_loss_kernel, B=B, C=c, H=h, W=w, denom=float(n * h * w),
        roll_v=roll_v, roll_h=roll_h, cache=cache)

    out = pl.pallas_call(
        kernel,
        out_shape=jax.ShapeDtypeStruct((1, 1), jnp.float32),
        grid=(2, nb),                    # (pass, image-block); pass outermost
        in_specs=in_specs,
        out_specs=pl.BlockSpec((1, 1), lambda p, i: (0, 0)),
        scratch_shapes=scratch_shapes,
        compiler_params=pltpu.CompilerParams(
            # Both axes carry sequential scratch state (global min/max, then
            # the L1 accumulation), so they must stay "arbitrary".
            dimension_semantics=("arbitrary", "arbitrary"),
            vmem_limit_bytes=vmem_limit,
        ),
    )(*operands)
    return out[0, 0]


# ------------- pure-JAX reference (mirrors the PyTorch module) -------------
def _ref_grad_layer(x):
    if x.shape[1] == 3:
        coeffs = jnp.array([65.738, 129.057, 25.064], jnp.float32) / 256.0
        x = jnp.sum(x * coeffs[None, :, None, None], axis=1, keepdims=True)
    xp = jnp.pad(x, ((0, 0), (0, 0), (1, 1), (1, 1)))
    x_v = xp[:, :, 2:, 1:-1] - xp[:, :, :-2, 1:-1]
    x_h = xp[:, :, 1:-1, 2:] - xp[:, :, 1:-1, :-2]
    g = jnp.sqrt(x_v * x_v + x_h * x_h + 1e-6)
    g = (g - g.min()) / (g.max() - g.min() + 1e-6)
    return (g - 0.5) * 2.0


def _ref_grad_loss(output, gt_img):
    return jnp.mean(jnp.abs(_ref_grad_layer(output) - _ref_grad_layer(gt_img)))


if __name__ == "__main__":
    key = jax.random.PRNGKey(0)
    tests = [
        ((2, 3, 16, 16), jnp.float32),    # sublane roll V + matmul H, VMEM cache
        ((2, 3, 16, 256), jnp.float32),   # rolls on both axes (validates roll path)
        ((3, 1, 12, 24), jnp.float32),    # matmul fallback on both axes, recompute path
        ((2, 3, 16, 128), jnp.bfloat16),  # native bf16 input, in-kernel f32 cast
    ]
    for shape, dtype in tests:
        key, k1, k2 = jax.random.split(key, 3)
        a = jax.random.uniform(k1, shape, dtype=jnp.float32).astype(dtype)
        b = jax.random.uniform(k2, shape, dtype=jnp.float32).astype(dtype)

        loss = jax.jit(grad_loss)(a, b)
        loss = jax.block_until_ready(loss)

        ref = _ref_grad_loss(a.astype(jnp.float32), b.astype(jnp.float32))
        assert abs(float(loss) - float(ref)) < 2e-5, \
            (shape, str(dtype), float(loss), float(ref))

    print("KERNEL_OK")
</pallas_src>

<mosaic_0001>
module attributes {stable_mosaic.version = 11 : i64} {
  func.func @_grad_loss_kernel(%arg0: i32, %arg1: i32, %arg2: memref<2x3x16x16xf32, #tpu.memory_space<vmem>>, %arg3: memref<2x3x16x16xf32, #tpu.memory_space<vmem>>, %arg4: memref<16x16xf32, #tpu.memory_space<vmem>>, %arg5: memref<1x1xf32, #tpu.memory_space<vmem>>, %arg6: memref<1x8xf32, #tpu.memory_space<vmem>>, %arg7: memref<2x16x16xf32, #tpu.memory_space<vmem>>, %arg8: memref<2x16x16xf32, #tpu.memory_space<vmem>>) attributes {dimension_semantics = [#tpu.dimension_semantics<arbitrary>, #tpu.dimension_semantics<arbitrary>], iteration_bounds = array<i64: 2, 1>, scalar_prefetch = 0 : i64, scratch_operands = 3 : i64, tpu.core_type = #tpu.core_type<tc>, window_params = [{transform_indices = @transform_0, window_bounds = array<i64: 2, 3, 16, 16>}, {transform_indices = @transform_1, window_bounds = array<i64: 2, 3, 16, 16>}, {pipeline_mode = #tpu.pipeline_mode<synchronous>, transform_indices = @transform_2, window_bounds = array<i64: 16, 16>}, {pipeline_mode = #tpu.pipeline_mode<synchronous>, transform_indices = @transform_3, window_bounds = array<i64: 1, 1>}]} {
    %0 = tpu.iota {dimensions = array<i32: 0>} : vector<16x16xi32>
    %c15_i32 = arith.constant 15 : i32
    %1 = vector.broadcast %c15_i32 : i32 to vector<16x16xi32>
    %2 = arith.cmpi slt, %0, %1 : vector<16x16xi32>
    %c0_i32 = arith.constant 0 : i32
    %3 = vector.broadcast %c0_i32 : i32 to vector<16x16xi32>
    %4 = arith.cmpi sgt, %0, %3 : vector<16x16xi32>
    %c0_i32_0 = arith.constant 0 : i32
    %5 = arith.cmpi eq, %arg0, %c0_i32_0 : i32
    %c0_i32_1 = arith.constant 0 : i32
    %6 = arith.cmpi eq, %arg1, %c0_i32_1 : i32
    %7 = arith.andi %5, %6 : i1
    %8 = arith.extui %7 : i1 to i32
    %c0_i32_2 = arith.constant 0 : i32
    %9 = arith.cmpi ne, %8, %c0_i32_2 : i32
    scf.if %9 {
      %21 = tpu.iota {dimensions = array<i32: 1>} : vector<1x8xi32>
      %c0_i32_9 = arith.constant 0 : i32
      %22 = vector.broadcast %c0_i32_9 : i32 to vector<1x8xi32>
      %23 = arith.cmpi eq, %21, %22 : vector<1x8xi32>
      %c2_i32 = arith.constant 2 : i32
      %24 = vector.broadcast %c2_i32 : i32 to vector<1x8xi32>
      %25 = arith.cmpi eq, %21, %24 : vector<1x8xi32>
      %26 = arith.ori %23, %25 : vector<1x8xi1>
      %c1_i32_10 = arith.constant 1 : i32
      %27 = vector.broadcast %c1_i32_10 : i32 to vector<1x8xi32>
      %28 = arith.cmpi eq, %21, %27 : vector<1x8xi32>
      %c3_i32 = arith.constant 3 : i32
      %29 = vector.broadcast %c3_i32 : i32 to vector<1x8xi32>
      %30 = arith.cmpi eq, %21, %29 : vector<1x8xi32>
      %31 = arith.ori %28, %30 : vector<1x8xi1>
      %cst = arith.constant -3.40282347E+38 : f32
      %cst_11 = arith.constant 0.000000e+00 : f32
      %32 = vector.broadcast %cst : f32 to vector<1x8xf32>
      %33 = vector.broadcast %cst_11 : f32 to vector<1x8xf32>
      %34 = arith.select %31, %32, %33 : vector<1x8xi1>, vector<1x8xf32>
      %cst_12 = arith.constant 3.40282347E+38 : f32
      %35 = vector.broadcast %cst_12 : f32 to vector<1x8xf32>
      %36 = arith.select %26, %35, %34 : vector<1x8xi1>, vector<1x8xf32>
      %c0 = arith.constant 0 : index
      %c0_13 = arith.constant 0 : index
      %37 = vector.load %arg6[%c0, %c0_13] : memref<1x8xf32, #tpu.memory_space<vmem>>, vector<1x8xf32>
      tpu.vector_store %arg6[%c0, %c0_13], %36 {strides = array<i32>} : memref<1x8xf32, #tpu.memory_space<vmem>>, vector<1x8xf32>,
    } else {
    }
    %c0_i32_3 = arith.constant 0 : i32
    %10 = arith.cmpi eq, %arg0, %c0_i32_3 : i32
    %11 = arith.extui %10 : i1 to i32
    %c0_i32_4 = arith.constant 0 : i32
    %12 = arith.cmpi ne, %11, %c0_i32_4 : i32
    scf.if %12 {
      %c0 = arith.constant 0 : index
      %c0_9 = arith.constant 0 : index
      %c0_10 = arith.constant 0 : index
      %c0_11 = arith.constant 0 : index
      %21 = vector.load %arg2[%c0, %c0_9, %c0_10, %c0_11] : memref<2x3x16x16xf32, #tpu.memory_space<vmem>>, vector<1x1x16x16xf32>
      %22 = vector.shape_cast %21 : vector<1x1x16x16xf32> to vector<16x16xf32>
      %cst = arith.constant 0.256789058 : f32
      %23 = vector.broadcast %cst : f32 to vector<16x16xf32>
      %24 = arith.mulf %22, %23 : vector<16x16xf32>
      %c0_12 = arith.constant 0 : index
      %c1 = arith.constant 1 : index
      %c0_13 = arith.constant 0 : index
      %c0_14 = arith.constant 0 : index
      %25 = vector.load %arg2[%c0_12, %c1, %c0_13, %c0_14] : memref<2x3x16x16xf32, #tpu.memory_space<vmem>>, vector<1x1x16x16xf32>
      %26 = vector.shape_cast %25 : vector<1x1x16x16xf32> to vector<16x16xf32>
      %cst_15 = arith.constant 0.504128933 : f32
      %27 = vector.broadcast %cst_15 : f32 to vector<16x16xf32>
      %28 = arith.mulf %26, %27 : vector<16x16xf32>
      %29 = arith.addf %24, %28 : vector<16x16xf32>
      %c0_16 = arith.constant 0 : index
      %c2 = arith.constant 2 : index
      %c0_17 = arith.constant 0 : index
      %c0_18 = arith.constant 0 : index
      %30 = vector.load %arg2[%c0_16, %c2, %c0_17, %c0_18] : memref<2x3x16x16xf32, #tpu.memory_space<vmem>>, vector<1x1x16x16xf32>
      %31 = vector.shape_cast %30 : vector<1x1x16x16xf32> to vector<16x16xf32>
      %cst_19 = arith.constant 0.0979062467 : f32
      %32 = vector.broadcast %cst_19 : f32 to vector<16x16xf32>
      %33 = arith.mulf %31, %32 : vector<16x16xf32>
      %34 = arith.addf %29, %33 : vector<16x16xf32>
      %c15_i32_20 = arith.constant 15 : i32
      %35 = tpu.dynamic_rotate %34 by %c15_i32_20 dim 0 : vector<16x16xf32>, i32 -> vector<16x16xf32>
      %c1_i32_21 = arith.constant 1 : i32
      %36 = tpu.dynamic_rotate %34 by %c1_i32_21 dim 0 : vector<16x16xf32>, i32 -> vector<16x16xf32>
      %cst_22 = arith.constant 0.000000e+00 : f32
      %37 = vector.broadcast %cst_22 : f32 to vector<16x16xf32>
      %38 = arith.select %2, %35, %37 : vector<16x16xi1>, vector<16x16xf32>
      %cst_23 = arith.constant 0.000000e+00 : f32
      %39 = vector.broadcast %cst_23 : f32 to vector<16x16xf32>
      %40 = arith.select %4, %36, %39 : vector<16x16xi1>, vector<16x16xf32>
      %41 = arith.subf %38, %40 : vector<16x16xf32>
      %c0_24 = arith.constant 0 : index
      %c0_25 = arith.constant 0 : index
      %42 = vector.load %arg4[%c0_24, %c0_25] : memref<16x16xf32, #tpu.memory_space<vmem>>, vector<16x16xf32>
      %cst_26 = arith.constant dense<0.000000e+00> : vector<16x16xf32>
      %43 = tpu.matmul %34, %42, %cst_26 {dimension_numbers = #tpu.dot_dimension_numbers<[1], [0], [0], [1], [0, 0, 1, 1], [], []>} : vector<16x16xf32>, vector<16x16xf32>, vector<16x16xf32> -> vector<16x16xf32>
      %44 = arith.mulf %41, %41 : vector<16x16xf32>
      %45 = arith.mulf %43, %43 : vector<16x16xf32>
      %46 = arith.addf %44, %45 : vector<16x16xf32>
      %cst_27 = arith.constant 9.99999997E-7 : f32
      %47 = vector.broadcast %cst_27 : f32 to vector<16x16xf32>
      %48 = arith.addf %46, %47 : vector<16x16xf32>
      %49 = math.sqrt %48 : vector<16x16xf32>
      %c0_28 = arith.constant 0 : index
      %c0_29 = arith.constant 0 : index
      %c0_30 = arith.constant 0 : index
      %c0_31 = arith.constant 0 : index
      %50 = vector.load %arg3[%c0_28, %c0_29, %c0_30, %c0_31] : memref<2x3x16x16xf32, #tpu.memory_space<vmem>>, vector<1x1x16x16xf32>
      %51 = vector.shape_cast %50 : vector<1x1x16x16xf32> to vector<16x16xf32>
      %cst_32 = arith.constant 0.256789058 : f32
      %52 = vector.broadcast %cst_32 : f32 to vector<16x16xf32>
      %53 = arith.mulf %51, %52 : vector<16x16xf32>
      %c0_33 = arith.constant 0 : index
      %c1_34 = arith.constant 1 : index
      %c0_35 = arith.constant 0 : index
      %c0_36 = arith.constant 0 : index
      %54 = vector.load %arg3[%c0_33, %c1_34, %c0_35, %c0_36] : memref<2x3x16x16xf32, #tpu.memory_space<vmem>>, vector<1x1x16x16xf32>
      %55 = vector.shape_cast %54 : vector<1x1x16x16xf32> to vector<16x16xf32>
      %cst_37 = arith.constant 0.504128933 : f32
      %56 = vector.broadcast %cst_37 : f32 to vector<16x16xf32>
      %57 = arith.mulf %55, %56 : vector<16x16xf32>
      %58 = arith.addf %53, %57 : vector<16x16xf32>
      %c0_38 = arith.constant 0 : index
      %c2_39 = arith.constant 2 : index
      %c0_40 = arith.constant 0 : index
      %c0_41 = arith.constant 0 : index
      %59 = vector.load %arg3[%c0_38, %c2_39, %c0_40, %c0_41] : memref<2x3x16x16xf32, #tpu.memory_space<vmem>>, vector<1x1x16x16xf32>
      %60 = vector.shape_cast %59 : vector<1x1x16x16xf32> to vector<16x16xf32>
      %cst_42 = arith.constant 0.0979062467 : f32
      %61 = vector.broadcast %cst_42 : f32 to vector<16x16xf32>
      %62 = arith.mulf %60, %61 : vector<16x16xf32>
      %63 = arith.addf %58, %62 : vector<16x16xf32>
      %c15_i32_43 = arith.constant 15 : i32
      %64 = tpu.dynamic_rotate %63 by %c15_i32_43 dim 0 : vector<16x16xf32>, i32 -> vector<16x16xf32>
      %c1_i32_44 = arith.constant 1 : i32
      %65 = tpu.dynamic_rotate %63 by %c1_i32_44 dim 0 : vector<16x16xf32>, i32 -> vector<16x16xf32>
      %cst_45 = arith.constant 0.000000e+00 : f32
      %66 = vector.broadcast %cst_45 : f32 to vector<16x16xf32>
      %67 = arith.select %2, %64, %66 : vector<16x16xi1>, vector<16x16xf32>
      %cst_46 = arith.constant 0.000000e+00 : f32
      %68 = vector.broadcast %cst_46 : f32 to vector<16x16xf32>
      %69 = arith.select %4, %65, %68 : vector<16x16xi1>, vector<16x16xf32>
      %70 = arith.subf %67, %69 : vector<16x16xf32>
      %c0_47 = arith.constant 0 : index
      %c0_48 = arith.constant 0 : index
      %71 = vector.load %arg4[%c0_47, %c0_48] : memref<16x16xf32, #tpu.memory_space<vmem>>, vector<16x16xf32>
      %cst_49 = arith.constant dense<0.000000e+00> : vector<16x16xf32>
      %72 = tpu.matmul %63, %71, %cst_49 {dimension_numbers = #tpu.dot_dimension_numbers<[1], [0], [0], [1], [0, 0, 1, 1], [], []>} : vector<16x16xf32>, vector<16x16xf32>, vector<16x16xf32> -> vector<16x16xf32>
      %73 = arith.mulf %70, %70 : vector<16x16xf32>
      %74 = arith.mulf %72, %72 : vector<16x16xf32>
      %75 = arith.addf %73, %74 : vector<16x16xf32>
      %cst_50 = arith.constant 9.99999997E-7 : f32
      %76 = vector.broadcast %cst_50 : f32 to vector<16x16xf32>
      %77 = arith.addf %75, %76 : vector<16x16xf32>
      %78 = math.sqrt %77 : vector<16x16xf32>
      %c2_i32 = arith.constant 2 : i32
      %79 = arith.muli %arg1, %c2_i32 : i32
      %c0_i32_51 = arith.constant 0 : i32
      %80 = arith.addi %79, %c0_i32_51 : i32
      %81 = arith.index_cast %80 : i32 to index
      %c0_52 = arith.constant 0 : index
      %c0_53 = arith.constant 0 : index
      %82 = vector.load %arg7[%81, %c0_52, %c0_53] : memref<2x16x16xf32, #tpu.memory_space<vmem>>, vector<1x16x16xf32>
      %83 = vector.shape_cast %82 : vector<1x16x16xf32> to vector<16x16xf32>
      %84 = vector.shape_cast %49 : vector<16x16xf32> to vector<1x16x16xf32>
      tpu.vector_store %arg7[%81, %c0_52, %c0_53], %84 {strides = array<i32>} : memref<2x16x16xf32, #tpu.memory_space<vmem>>, vector<1x16x16xf32>,
      %85 = arith.index_cast %80 : i32 to index
      %c0_54 = arith.constant 0 : index
      %c0_55 = arith.constant 0 : index
      %86 = vector.load %arg8[%85, %c0_54, %c0_55] : memref<2x16x16xf32, #tpu.memory_space<vmem>>, vector<1x16x16xf32>
      %87 = vector.shape_cast %86 : vector<1x16x16xf32> to vector<16x16xf32>
      %88 = vector.shape_cast %78 : vector<16x16xf32> to vector<1x16x16xf32>
      tpu.vector_store %arg8[%85, %c0_54, %c0_55], %88 {strides = array<i32>} : memref<2x16x16xf32, #tpu.memory_space<vmem>>, vector<1x16x16xf32>,
      %89 = vector.shape_cast %49 : vector<16x16xf32> to vector<1x16x16xf32>
      %cst_56 = arith.constant dense<0x7F800000> : vector<1xf32>
      %90 = vector.multi_reduction <minimumf>, %89, %cst_56 [1, 2] : vector<1x16x16xf32> to vector<1xf32>
      %91 = vector.shape_cast %90 : vector<1xf32> to vector<1x1x1xf32>
      %92 = vector.extract %91[0, 0, 0] : f32 from vector<1x1x1xf32>
      %93 = vector.broadcast %92 : f32 to vector<1x1xf32>
      %94 = vector.shape_cast %49 : vector<16x16xf32> to vector<1x16x16xf32>
      %cst_57 = arith.constant dense<0xFF800000> : vector<1xf32>
      %95 = vector.multi_reduction <maximumf>, %94, %cst_57 [1, 2] : vector<1x16x16xf32> to vector<1xf32>
      %96 = vector.shape_cast %95 : vector<1xf32> to vector<1x1x1xf32>
      %97 = vector.extract %96[0, 0, 0] : f32 from vector<1x1x1xf32>
      %98 = vector.broadcast %97 : f32 to vector<1x1xf32>
      %99 = vector.shape_cast %78 : vector<16x16xf32> to vector<1x16x16xf32>
      %cst_58 = arith.constant dense<0x7F800000> : vector<1xf32>
      %100 = vector.multi_reduction <minimumf>, %99, %cst_58 [1, 2] : vector<1x16x16xf32> to vector<1xf32>
      %101 = vector.shape_cast %100 : vector<1xf32> to vector<1x1x1xf32>
      %102 = vector.extract %101[0, 0, 0] : f32 from vector<1x1x1xf32>
      %103 = vector.broadcast %102 : f32 to vector<1x1xf32>
      %104 = vector.shape_cast %78 : vector<16x16xf32> to vector<1x16x16xf32>
      %cst_59 = arith.constant dense<0xFF800000> : vector<1xf32>
      %105 = vector.multi_reduction <maximumf>, %104, %cst_59 [1, 2] : vector<1x16x16xf32> to vector<1xf32>
      %106 = vector.shape_cast %105 : vector<1xf32> to vector<1x1x1xf32>
      %107 = vector.extract %106[0, 0, 0] : f32 from vector<1x1x1xf32>
      %108 = vector.broadcast %107 : f32 to vector<1x1xf32>
      %c1_60 = arith.constant 1 : index
      %c0_61 = arith.constant 0 : index
      %c0_62 = arith.constant 0 : index
      %c0_63 = arith.constant 0 : index
      %109 = vector.load %arg2[%c1_60, %c0_61, %c0_62, %c0_63] : memref<2x3x16x16xf32, #tpu.memory_space<vmem>>, vector<1x1x16x16xf32>
      %110 = vector.shape_cast %109 : vector<1x1x16x16xf32> to vector<16x16xf32>
      %cst_64 = arith.constant 0.256789058 : f32
      %111 = vector.broadcast %cst_64 : f32 to vector<16x16xf32>
      %112 = arith.mulf %110, %111 : vector<16x16xf32>
      %c1_65 = arith.constant 1 : index
      %c1_66 = arith.constant 1 : index
      %c0_67 = arith.constant 0 : index
      %c0_68 = arith.constant 0 : index
      %113 = vector.load %arg2[%c1_65, %c1_66, %c0_67, %c0_68] : memref<2x3x16x16xf32, #tpu.memory_space<vmem>>, vector<1x1x16x16xf32>
      %114 = vector.shape_cast %113 : vector<1x1x16x16xf32> to vector<16x16xf32>
      %cst_69 = arith.constant 0.504128933 : f32
      %115 = vector.broadcast %cst_69 : f32 to vector<16x16xf32>
      %116 = arith.mulf %114, %115 : vector<16x16xf32>
      %117 = arith.addf %112, %116 : vector<16x16xf32>
      %c1_70 = arith.constant 1 : index
      %c2_71 = arith.constant 2 : index
      %c0_72 = arith.constant 0 : index
      %c0_73 = arith.constant 0 : index
      %118 = vector.load %arg2[%c1_70, %c2_71, %c0_72, %c0_73] : memref<2x3x16x16xf32, #tpu.memory_space<vmem>>, vector<1x1x16x16xf32>
      %119 = vector.shape_cast %118 : vector<1x1x16x16xf32> to vector<16x16xf32>
      %cst_74 = arith.constant 0.0979062467 : f32
      %120 = vector.broadcast %cst_74 : f32 to vector<16x16xf32>
      %121 = arith.mulf %119, %120 : vector<16x16xf32>
      %122 = arith.addf %117, %121 : vector<16x16xf32>
      %c15_i32_75 = arith.constant 15 : i32
      %123 = tpu.dynamic_rotate %122 by %c15_i32_75 dim 0 : vector<16x16xf32>, i32 -> vector<16x16xf32>
      %c1_i32_76 = arith.constant 1 : i32
      %124 = tpu.dynamic_rotate %122 by %c1_i32_76 dim 0 : vector<16x16xf32>, i32 -> vector<16x16xf32>
      %cst_77 = arith.constant 0.000000e+00 : f32
      %125 = vector.broadcast %cst_77 : f32 to vector<16x16xf32>
      %126 = arith.select %2, %123, %125 : vector<16x16xi1>, vector<16x16xf32>
      %cst_78 = arith.constant 0.000000e+00 : f32
      %127 = vector.broadcast %cst_78 : f32 to vector<16x16xf32>
      %128 = arith.select %4, %124, %127 : vector<16x16xi1>, vector<16x16xf32>
      %129 = arith.subf %126, %128 : vector<16x16xf32>
      %c0_79 = arith.constant 0 : index
      %c0_80 = arith.constant 0 : index
      %130 = vector.load %arg4[%c0_79, %c0_80] : memref<16x16xf32, #tpu.memory_space<vmem>>, vector<16x16xf32>
      %cst_81 = arith.constant dense<0.000000e+00> : vector<16x16xf32>
      %131 = tpu.matmul %122, %130, %cst_81 {dimension_numbers = #tpu.dot_dimension_numbers<[1], [0], [0], [1], [0, 0, 1, 1], [], []>} : vector<16x16xf32>, vector<16x16xf32>, vector<16x16xf32> -> vector<16x16xf32>
      %132 = arith.mulf %129, %129 : vector<16x16xf32>
      %133 = arith.mulf %131, %131 : vector<16x16xf32>
      %134 = arith.addf %132, %133 : vector<16x16xf32>
      %cst_82 = arith.constant 9.99999997E-7 : f32
      %135 = vector.broadcast %cst_82 : f32 to vector<16x16xf32>
      %136 = arith.addf %134, %135 : vector<16x16xf32>
      %137 = math.sqrt %136 : vector<16x16xf32>
      %c1_83 = arith.constant 1 : index
      %c0_84 = arith.constant 0 : index
      %c0_85 = arith.constant 0 : index
      %c0_86 = arith.constant 0 : index
      %138 = vector.load %arg3[%c1_83, %c0_84, %c0_85, %c0_86] : memref<2x3x16x16xf32, #tpu.memory_space<vmem>>, vector<1x1x16x16xf32>
      %139 = vector.shape_cast %138 : vector<1x1x16x16xf32> to vector<16x16xf32>
      %cst_87 = arith.constant 0.256789058 : f32
      %140 = vector.broadcast %cst_87 : f32 to vector<16x16xf32>
      %141 = arith.mulf %139, %140 : vector<16x16xf32>
      %c1_88 = arith.constant 1 : index
      %c1_89 = arith.constant 1 : index
      %c0_90 = arith.constant 0 : index
      %c0_91 = arith.constant 0 : index
      %142 = vector.load %arg3[%c1_88, %c1_89, %c0_90, %c0_91] : memref<2x3x16x16xf32, #tpu.memory_space<vmem>>, vector<1x1x16x16xf32>
      %143 = vector.shape_cast %142 : vector<1x1x16x16xf32> to vector<16x16xf32>
      %cst_92 = arith.constant 0.504128933 : f32
      %144 = vector.broadcast %cst_92 : f32 to vector<16x16xf32>
      %145 = arith.mulf %143, %144 : vector<16x16xf32>
      %146 = arith.addf %141, %145 : vector<16x16xf32>
      %c1_93 = arith.constant 1 : index
      %c2_94 = arith.constant 2 : index
      %c0_95 = arith.constant 0 : index
      %c0_96 = arith.constant 0 : index
      %147 = vector.load %arg3[%c1_93, %c2_94, %c0_95, %c0_96] : memref<2x3x16x16xf32, #tpu.memory_space<vmem>>, vector<1x1x16x16xf32>
      %148 = vector.shape_cast %147 : vector<1x1x16x16xf32> to vector<16x16xf32>
      %cst_97 = arith.constant 0.0979062467 : f32
      %149 = vector.broadcast %cst_97 : f32 to vector<16x16xf32>
      %150 = arith.mulf %148, %149 : vector<16x16xf32>
      %151 = arith.addf %146, %150 : vector<16x16xf32>
      %c15_i32_98 = arith.constant 15 : i32
      %152 = tpu.dynamic_rotate %151 by %c15_i32_98 dim 0 : vector<16x16xf32>, i32 -> vector<16x16xf32>
      %c1_i32_99 = arith.constant 1 : i32
      %153 = tpu.dynamic_rotate %151 by %c1_i32_99 dim 0 : vector<16x16xf32>, i32 -> vector<16x16xf32>
      %cst_100 = arith.constant 0.000000e+00 : f32
      %154 = vector.broadcast %cst_100 : f32 to vector<16x16xf32>
      %155 = arith.select %2, %152, %154 : vector<16x16xi1>, vector<16x16xf32>
      %cst_101 = arith.constant 0.000000e+00 : f32
      %156 = vector.broadcast %cst_101 : f32 to vector<16x16xf32>
      %157 = arith.select %4, %153, %156 : vector<16x16xi1>, vector<16x16xf32>
      %158 = arith.subf %155, %157 : vector<16x16xf32>
      %c0_102 = arith.constant 0 : index
      %c0_103 = arith.constant 0 : index
      %159 = vector.load %arg4[%c0_102, %c0_103] : memref<16x16xf32, #tpu.memory_space<vmem>>, vector<16x16xf32>
      %cst_104 = arith.constant dense<0.000000e+00> : vector<16x16xf32>
      %160 = tpu.matmul %151, %159, %cst_104 {dimension_numbers = #tpu.dot_dimension_numbers<[1], [0], [0], [1], [0, 0, 1, 1], [], []>} : vector<16x16xf32>, vector<16x16xf32>, vector<16x16xf32> -> vector<16x16xf32>
      %161 = arith.mulf %158, %158 : vector<16x16xf32>
      %162 = arith.mulf %160, %160 : vector<16x16xf32>
      %163 = arith.addf %161, %162 : vector<16x16xf32>
      %cst_105 = arith.constant 9.99999997E-7 : f32
      %164 = vector.broadcast %cst_105 : f32 to vector<16x16xf32>
      %165 = arith.addf %163, %164 : vector<16x16xf32>
      %166 = math.sqrt %165 : vector<16x16xf32>
      %c2_i32_106 = arith.constant 2 : i32
      %167 = arith.muli %arg1, %c2_i32_106 : i32
      %c1_i32_107 = arith.constant 1 : i32
      %168 = arith.addi %167, %c1_i32_107 : i32
      %169 = arith.index_cast %168 : i32 to index
      %c0_108 = arith.constant 0 : index
      %c0_109 = arith.constant 0 : index
      %170 = vector.load %arg7[%169, %c0_108, %c0_109] : memref<2x16x16xf32, #tpu.memory_space<vmem>>, vector<1x16x16xf32>
      %171 = vector.shape_cast %170 : vector<1x16x16xf32> to vector<16x16xf32>
      %172 = vector.shape_cast %137 : vector<16x16xf32> to vector<1x16x16xf32>
      tpu.vector_store %arg7[%169, %c0_108, %c0_109], %172 {strides = array<i32>} : memref<2x16x16xf32, #tpu.memory_space<vmem>>, vector<1x16x16xf32>,
      %173 = arith.index_cast %168 : i32 to index
      %c0_110 = arith.constant 0 : index
      %c0_111 = arith.constant 0 : index
      %174 = vector.load %arg8[%173, %c0_110, %c0_111] : memref<2x16x16xf32, #tpu.memory_space<vmem>>, vector<1x16x16xf32>
      %175 = vector.shape_cast %174 : vector<1x16x16xf32> to vector<16x16xf32>
      %176 = vector.shape_cast %166 : vector<16x16xf32> to vector<1x16x16xf32>
      tpu.vector_store %arg8[%173, %c0_110, %c0_111], %176 {strides = array<i32>} : memref<2x16x16xf32, #tpu.memory_space<vmem>>, vector<1x16x16xf32>,
      %177 = vector.shape_cast %137 : vector<16x16xf32> to vector<1x16x16xf32>
      %cst_112 = arith.constant dense<0x7F800000> : vector<1xf32>
      %178 = vector.multi_reduction <minimumf>, %177, %cst_112 [1, 2] : vector<1x16x16xf32> to vector<1xf32>
      %179 = vector.shape_cast %178 : vector<1xf32> to vector<1x1x1xf32>
      %180 = vector.extract %179[0, 0, 0] : f32 from vector<1x1x1xf32>
      %181 = vector.broadcast %180 : f32 to vector<1x1xf32>
      %182 = vector.shape_cast %137 : vector<16x16xf32> to vector<1x16x16xf32>
      %cst_113 = arith.constant dense<0xFF800000> : vector<1xf32>
      %183 = vector.multi_reduction <maximumf>, %182, %cst_113 [1, 2] : vector<1x16x16xf32> to vector<1xf32>
      %184 = vector.shape_cast %183 : vector<1xf32> to vector<1x1x1xf32>
      %185 = vector.extract %184[0, 0, 0] : f32 from vector<1x1x1xf32>
      %186 = vector.broadcast %185 : f32 to vector<1x1xf32>
      %187 = vector.shape_cast %166 : vector<16x16xf32> to vector<1x16x16xf32>
      %cst_114 = arith.constant dense<0x7F800000> : vector<1xf32>
      %188 = vector.multi_reduction <minimumf>, %187, %cst_114 [1, 2] : vector<1x16x16xf32> to vector<1xf32>
      %189 = vector.shape_cast %188 : vector<1xf32> to vector<1x1x1xf32>
      %190 = vector.extract %189[0, 0, 0] : f32 from vector<1x1x1xf32>
      %191 = vector.broadcast %190 : f32 to vector<1x1xf32>
      %192 = vector.shape_cast %166 : vector<16x16xf32> to vector<1x16x16xf32>
      %cst_115 = arith.constant dense<0xFF800000> : vector<1xf32>
      %193 = vector.multi_reduction <maximumf>, %192, %cst_115 [1, 2] : vector<1x16x16xf32> to vector<1xf32>
      %194 = vector.shape_cast %193 : vector<1xf32> to vector<1x1x1xf32>
      %195 = vector.extract %194[0, 0, 0] : f32 from vector<1x1x1xf32>
      %196 = vector.broadcast %195 : f32 to vector<1x1xf32>
      %197 = arith.minimumf %93, %181 : vector<1x1xf32>
      %198 = arith.maximumf %98, %186 : vector<1x1xf32>
      %199 = arith.minimumf %103, %191 : vector<1x1xf32>
      %200 = arith.maximumf %108, %196 : vector<1x1xf32>
      %c0_116 = arith.constant 0 : index
      %c0_117 = arith.constant 0 : index
      %201 = vector.load %arg6[%c0_116, %c0_117] : memref<1x8xf32, #tpu.memory_space<vmem>>, vector<1x1xf32>
      %202 = arith.minimumf %201, %197 : vector<1x1xf32>
      %c0_118 = arith.constant 0 : index
      %c0_119 = arith.constant 0 : index
      %203 = vector.load %arg6[%c0_118, %c0_119] : memref<1x8xf32, #tpu.memory_space<vmem>>, vector<1x1xf32>
      tpu.vector_store %arg6[%c0_118, %c0_119], %202 {strides = array<i32>} : memref<1x8xf32, #tpu.memory_space<vmem>>, vector<1x1xf32>,
      %c0_120 = arith.constant 0 : index
      %c1_121 = arith.constant 1 : index
      %204 = vector.load %arg6[%c0_120, %c1_121] : memref<1x8xf32, #tpu.memory_space<vmem>>, vector<1x1xf32>
      %205 = arith.maximumf %204, %198 : vector<1x1xf32>
      %c0_122 = arith.constant 0 : index
      %c1_123 = arith.constant 1 : index
      %206 = vector.load %arg6[%c0_122, %c1_123] : memref<1x8xf32, #tpu.memory_space<vmem>>, vector<1x1xf32>
      tpu.vector_store %arg6[%c0_122, %c1_123], %205 {strides = array<i32>} : memref<1x8xf32, #tpu.memory_space<vmem>>, vector<1x1xf32>,
      %c0_124 = arith.constant 0 : index
      %c2_125 = arith.constant 2 : index
      %207 = vector.load %arg6[%c0_124, %c2_125] : memref<1x8xf32, #tpu.memory_space<vmem>>, vector<1x1xf32>
      %208 = arith.minimumf %207, %199 : vector<1x1xf32>
      %c0_126 = arith.constant 0 : index
      %c2_127 = arith.constant 2 : index
      %209 = vector.load %arg6[%c0_126, %c2_127] : memref<1x8xf32, #tpu.memory_space<vmem>>, vector<1x1xf32>
      tpu.vector_store %arg6[%c0_126, %c2_127], %208 {strides = array<i32>} : memref<1x8xf32, #tpu.memory_space<vmem>>, vector<1x1xf32>,
      %c0_128 = arith.constant 0 : index
      %c3 = arith.constant 3 : index
      %210 = vector.load %arg6[%c0_128, %c3] : memref<1x8xf32, #tpu.memory_space<vmem>>, vector<1x1xf32>
      %211 = arith.maximumf %210, %200 : vector<1x1xf32>
      %c0_129 = arith.constant 0 : index
      %c3_130 = arith.constant 3 : index
      %212 = vector.load %arg6[%c0_129, %c3_130] : memref<1x8xf32, #tpu.memory_space<vmem>>, vector<1x1xf32>
      tpu.vector_store %arg6[%c0_129, %c3_130], %211 {strides = array<i32>} : memref<1x8xf32, #tpu.memory_space<vmem>>, vector<1x1xf32>,
    } else {
    }
    %c1_i32 = arith.constant 1 : i32
    %13 = arith.cmpi eq, %arg0, %c1_i32 : i32
    %14 = arith.extui %13 : i1 to i32
    %c0_i32_5 = arith.constant 0 : i32
    %15 = arith.cmpi ne, %14, %c0_i32_5 : i32
    scf.if %15 {
      %c0 = arith.constant 0 : index
      %c0_9 = arith.constant 0 : index
      %21 = vector.load %arg6[%c0, %c0_9] : memref<1x8xf32, #tpu.memory_space<vmem>>, vector<1x1xf32>
      %c0_10 = arith.constant 0 : index
      %c1 = arith.constant 1 : index
      %22 = vector.load %arg6[%c0_10, %c1] : memref<1x8xf32, #tpu.memory_space<vmem>>, vector<1x1xf32>
      %c0_11 = arith.constant 0 : index
      %c2 = arith.constant 2 : index
      %23 = vector.load %arg6[%c0_11, %c2] : memref<1x8xf32, #tpu.memory_space<vmem>>, vector<1x1xf32>
      %c0_12 = arith.constant 0 : index
      %c3 = arith.constant 3 : index
      %24 = vector.load %arg6[%c0_12, %c3] : memref<1x8xf32, #tpu.memory_space<vmem>>, vector<1x1xf32>
      %25 = arith.subf %22, %21 : vector<1x1xf32>
      %cst = arith.constant 9.99999997E-7 : f32
      %26 = vector.broadcast %cst : f32 to vector<1x1xf32>
      %27 = arith.addf %25, %26 : vector<1x1xf32>
      %28 = tpu.reciprocal %27 : vector<1x1xf32> -> vector<1x1xf32>
      %cst_13 = arith.constant 2.000000e+00 : f32
      %29 = vector.broadcast %cst_13 : f32 to vector<1x1xf32>
      %30 = arith.mulf %29, %28 : vector<1x1xf32>
      %31 = arith.subf %24, %23 : vector<1x1xf32>
      %cst_14 = arith.constant 9.99999997E-7 : f32
      %32 = vector.broadcast %cst_14 : f32 to vector<1x1xf32>
      %33 = arith.addf %31, %32 : vector<1x1xf32>
      %34 = tpu.reciprocal %33 : vector<1x1xf32> -> vector<1x1xf32>
      %cst_15 = arith.constant 2.000000e+00 : f32
      %35 = vector.broadcast %cst_15 : f32 to vector<1x1xf32>
      %36 = arith.mulf %35, %34 : vector<1x1xf32>
      %37 = arith.mulf %23, %36 : vector<1x1xf32>
      %38 = arith.mulf %21, %30 : vector<1x1xf32>
      %39 = arith.subf %37, %38 : vector<1x1xf32>
      %cst_16 = arith.constant 0.000000e+00 : f32
      %40 = vector.broadcast %cst_16 : f32 to vector<1x1xf32>
      %c2_i32 = arith.constant 2 : i32
      %41 = arith.muli %arg1, %c2_i32 : i32
      %c0_i32_17 = arith.constant 0 : i32
      %42 = arith.addi %41, %c0_i32_17 : i32
      %43 = arith.index_cast %42 : i32 to index
      %c0_18 = arith.constant 0 : index
      %c0_19 = arith.constant 0 : index
      %44 = vector.load %arg7[%43, %c0_18, %c0_19] : memref<2x16x16xf32, #tpu.memory_space<vmem>>, vector<1x16x16xf32>
      %45 = vector.shape_cast %44 : vector<1x16x16xf32> to vector<16x16xf32>
      %46 = arith.index_cast %42 : i32 to index
      %c0_20 = arith.constant 0 : index
      %c0_21 = arith.constant 0 : index
      %47 = vector.load %arg8[%46, %c0_20, %c0_21] : memref<2x16x16xf32, #tpu.memory_space<vmem>>, vector<1x16x16xf32>
      %48 = vector.shape_cast %47 : vector<1x16x16xf32> to vector<16x16xf32>
      %49 = vector.broadcast %30 : vector<1x1xf32> to vector<16x16xf32>
      %50 = arith.mulf %45, %49 : vector<16x16xf32>
      %51 = vector.broadcast %36 : vector<1x1xf32> to vector<16x16xf32>
      %52 = arith.mulf %48, %51 : vector<16x16xf32>
      %53 = arith.subf %50, %52 : vector<16x16xf32>
      %54 = vector.broadcast %39 : vector<1x1xf32> to vector<16x16xf32>
      %55 = arith.addf %53, %54 : vector<16x16xf32>
      %56 = math.absf %55 : vector<16x16xf32>
      %57 = vector.shape_cast %56 : vector<16x16xf32> to vector<1x16x16xf32>
      %cst_22 = arith.constant dense<0.000000e+00> : vector<1xf32>
      %58 = vector.multi_reduction <add>, %57, %cst_22 [1, 2] : vector<1x16x16xf32> to vector<1xf32>
      %59 = vector.shape_cast %58 : vector<1xf32> to vector<1x1x1xf32>
      %60 = vector.extract %59[0, 0, 0] : f32 from vector<1x1x1xf32>
      %61 = vector.broadcast %60 : f32 to vector<1x1xf32>
      %62 = arith.addf %40, %61 : vector<1x1xf32>
      %c2_i32_23 = arith.constant 2 : i32
      %63 = arith.muli %arg1, %c2_i32_23 : i32
      %c1_i32_24 = arith.constant 1 : i32
      %64 = arith.addi %63, %c1_i32_24 : i32
      %65 = arith.index_cast %64 : i32 to index
      %c0_25 = arith.constant 0 : index
      %c0_26 = arith.constant 0 : index
      %66 = vector.load %arg7[%65, %c0_25, %c0_26] : memref<2x16x16xf32, #tpu.memory_space<vmem>>, vector<1x16x16xf32>
      %67 = vector.shape_cast %66 : vector<1x16x16xf32> to vector<16x16xf32>
      %68 = arith.index_cast %64 : i32 to index
      %c0_27 = arith.constant 0 : index
      %c0_28 = arith.constant 0 : index
      %69 = vector.load %arg8[%68, %c0_27, %c0_28] : memref<2x16x16xf32, #tpu.memory_space<vmem>>, vector<1x16x16xf32>
      %70 = vector.shape_cast %69 : vector<1x16x16xf32> to vector<16x16xf32>
      %71 = vector.broadcast %30 : vector<1x1xf32> to vector<16x16xf32>
      %72 = arith.mulf %67, %71 : vector<16x16xf32>
      %73 = vector.broadcast %36 : vector<1x1xf32> to vector<16x16xf32>
      %74 = arith.mulf %70, %73 : vector<16x16xf32>
      %75 = arith.subf %72, %74 : vector<16x16xf32>
      %76 = vector.broadcast %39 : vector<1x1xf32> to vector<16x16xf32>
      %77 = arith.addf %75, %76 : vector<16x16xf32>
      %78 = math.absf %77 : vector<16x16xf32>
      %79 = vector.shape_cast %78 : vector<16x16xf32> to vector<1x16x16xf32>
      %cst_29 = arith.constant dense<0.000000e+00> : vector<1xf32>
      %80 = vector.multi_reduction <add>, %79, %cst_29 [1, 2] : vector<1x16x16xf32> to vector<1xf32>
      %81 = vector.shape_cast %80 : vector<1xf32> to vector<1x1x1xf32>
      %82 = vector.extract %81[0, 0, 0] : f32 from vector<1x1x1xf32>
      %83 = vector.broadcast %82 : f32 to vector<1x1xf32>
      %84 = arith.addf %62, %83 : vector<1x1xf32>
      %c0_30 = arith.constant 0 : index
      %c4 = arith.constant 4 : index
      %85 = vector.load %arg6[%c0_30, %c4] : memref<1x8xf32, #tpu.memory_space<vmem>>, vector<1x1xf32>
      %86 = arith.addf %85, %84 : vector<1x1xf32>
      %c0_31 = arith.constant 0 : index
      %c4_32 = arith.constant 4 : index
      %87 = vector.load %arg6[%c0_31, %c4_32] : memref<1x8xf32, #tpu.memory_space<vmem>>, vector<1x1xf32>
      tpu.vector_store %arg6[%c0_31, %c4_32], %86 {strides = array<i32>} : memref<1x8xf32, #tpu.memory_space<vmem>>, vector<1x1xf32>,
    } else {
    }
    %c1_i32_6 = arith.constant 1 : i32
    %16 = arith.cmpi eq, %arg0, %c1_i32_6 : i32
    %c0_i32_7 = arith.constant 0 : i32
    %17 = arith.cmpi eq, %arg1, %c0_i32_7 : i32
    %18 = arith.andi %16, %17 : i1
    %19 = arith.extui %18 : i1 to i32
    %c0_i32_8 = arith.constant 0 : i32
    %20 = arith.cmpi ne, %19, %c0_i32_8 : i32
    scf.if %20 {
      %c0 = arith.constant 0 : index
      %c4 = arith.constant 4 : index
      %21 = vector.load %arg6[%c0, %c4] : memref<1x8xf32, #tpu.memory_space<vmem>>, vector<1x1xf32>
      %cst = arith.constant 0.001953125 : f32
      %22 = vector.broadcast %cst : f32 to vector<1x1xf32>
      %23 = arith.mulf %21, %22 : vector<1x1xf32>
      %c0_9 = arith.constant 0 : index
      %c0_10 = arith.constant 0 : index
      %24 = vector.load %arg5[%c0_9, %c0_10] : memref<1x1xf32, #tpu.memory_space<vmem>>, vector<1x1xf32>
      tpu.vector_store %arg5[%c0_9, %c0_10], %23 {strides = array<i32>} : memref<1x1xf32, #tpu.memory_space<vmem>>, vector<1x1xf32>,
    } else {
    }
    return
  }
  func.func @transform_0(%arg0: i32, %arg1: i32) -> (i32, i32, i32, i32) {
    %c1_i32 = arith.constant 1 : i32
    %0 = arith.subi %c1_i32, %arg0 : i32
    %1 = arith.muli %arg1, %0 : i32
    %c0_i32 = arith.constant 0 : i32
    %c0_i32_0 = arith.constant 0 : i32
    %c0_i32_1 = arith.constant 0 : i32
    %c0_i32_2 = arith.constant 0 : i32
    return %1, %c0_i32, %c0_i32_0, %c0_i32_1 : i32, i32, i32, i32
  }
  func.func @transform_1(%arg0: i32, %arg1: i32) -> (i32, i32, i32, i32) {
    %c1_i32 = arith.constant 1 : i32
    %0 = arith.subi %c1_i32, %arg0 : i32
    %1 = arith.muli %arg1, %0 : i32
    %c0_i32 = arith.constant 0 : i32
    %c0_i32_0 = arith.constant 0 : i32
    %c0_i32_1 = arith.constant 0 : i32
    %c0_i32_2 = arith.constant 0 : i32
    return %1, %c0_i32, %c0_i32_0, %c0_i32_1 : i32, i32, i32, i32
  }
  func.func @transform_2(%arg0: i32, %arg1: i32) -> (i32, i32) {
    %c0_i32 = arith.constant 0 : i32
    %c0_i32_0 = arith.constant 0 : i32
    %c0_i32_1 = arith.constant 0 : i32
    return %c0_i32, %c0_i32_0 : i32, i32
  }
  func.func @transform_3(%arg0: i32, %arg1: i32) -> (i32, i32) {
    %c0_i32 = arith.constant 0 : i32
    %c0_i32_0 = arith.constant 0 : i32
    %c0_i32_1 = arith.constant 0 : i32
    return %c0_i32, %c0_i32_0 : i32, i32
  }
}

</mosaic_0001>

<bundles_post_ra>
// kernel: grad_loss.1
= control target key start
LH: loop header
LB: loop body
LE: loop exit
PB: predicated region body
PF: predicated region fallthrough
CT: control target
= control target key end

     0   :  { %8 = vsyncpa [#allocation6], 0  ;;  %s1920_s0 = inlined_call_operand.hbm [shape: f32[2,3,16,16], index: 0, kind: input, shape index: {}]   ;;  %s1921_s1 = inlined_call_operand.hbm [shape: f32[2,3,16,16], index: 1, kind: input, shape index: {}]   ;;  %s1922_s2 = inlined_call_operand.vmem [shape: f32[16,16], index: 2, kind: input, shape index: {}]   ;;  %s1923_s3 = inlined_call_operand.hbm [shape: f32[1,1], index: 3, kind: output, shape index: {}]  }
   0x1   :  { %10 = vsyncpa [#allocation6 + $0x1], 0 }
   0x2   :  { %11 = vsyncpa [#allocation9], 0 }
   0x3   :  { %13 = vsyncpa [#allocation9 + $0x1], 0 }
   0x4   :  { %14 = vsyncpa [#allocation7], 0  ;;  %s1577_s12 = smov 0   ;;  %s1579_s13 = smov 0  }
   0x5   :  { %s1581_s14 = smov 0  }
   0x6 LB: > { %s1207_s15 = sadd.s32 4294967295, %s1542_s14   ;;  %s32_s16 = sadd.s32 1, %s1538_s13  ;;  %s1542_s14 = sphi %s1581_s14, %s20_s14   ;;  %s1538_s13 = sphi %s1579_s13, %s1932_s13   ;;  %s1534_s12 = sphi %s1577_s12, %s1931_s12  }
   0x7   : > { %p34_p0 = scmp.ge.s32.totalorder %s32_s16, 2  ;;  %p1360_p1 = scmp.lt.s32.totalorder %s1542_s14, 2 }
   0x8   : > { %p1361_p2 = scmp.eq.s32.totalorder %s1542_s14, 0  ;;  %s1544_s17 = smov [#allocation5]  }
   0x9   : > { %s1934_s16 = smov (%p34_p0, %s32_s16), 0  ;;  %s169_s18 = sshll.u32 %s1544_s17, 4  ;;  %s170_s18 = int_to_ptr.vmem [resolvable:$true] %s169_s18 }
   0xa   : > { %p1598_p3 = pnand %p1361_p2, %p1360_p1  ;;  %s1426_s22 = scalar_lea.hbm %s1920_s0, 1536 }
   0xb   : > { %p1427_p6 = scmp.ne.s32.totalorder %s1920_s0, %s1426_s22  ;;  %p1433_p10 = scmp.lt.u32.totalorder %s1426_s22, %s1920_s0 }
   0xc   : > { %p1428_p7 = pneg %p1598_p3 }
   0xe   : > { %p1429_p8 = pnand %p1428_p7, %p1427_p6 }
  0x10   : > { %p1430_p9 = pneg %p1429_p8 }
  0x12   : > { %p1435_p11 = pnand %p1433_p10, %p1430_p9 }
  0x14   : > { %1438 = shalt.err (!%p1435_p11)
}
  0x15   : > { %s1439_s27 = scalar_lea.vmem %s170_s18, 1536  ;;  %s1446_s28 = scalar_lea.vmem %s170_s18, 3072 }
  0x16   : > { %p1440_p12 = scmp.ne.s32.totalorder %s170_s18, %s1439_s27  ;;  %p1447_p1 = scmp.lt.s32.totalorder %s170_s18, %s170_s18 }
  0x17   : > { %p1448_p2 = scmp.lt.s32.totalorder %s1446_s28, %s1439_s27 }
  0x18   : > { %p1442_p13 = pnand %p1440_p12, %p1428_p7 }
  0x19   : > { %p1449_p4 = por %p1448_p2, %p1447_p1 }
  0x1a   : > { %p1443_p0 = pneg %p1442_p13 }
  0x1c   : > { %p1450_p5 = pnand %p1449_p4, %p1443_p0 }
  0x1e   : > { %1453 = shalt.err (!%p1450_p5)
}
  0x1f   : > { %s1545_s29 = smov 128   ;;  %s1546_s30 = smov 8  }
  0x20   : > { %1356 = dma.hbm_to_vmem [thread:$0]  (!%p1598_p3), %s1920_s0, 1536, %s170_s18, [#allocation6], %s1545_s29, %s1545_s29, %s1546_s30  }
  0x21   : > { %p1925_p6 = scmp.lt.s32.totalorder %s1542_s14, 3  ;;  %p1926_p8 = scmp.ge.s32.totalorder %s1542_s14, 1 }
  0x22   : > { %s1547_s7 = smov [#allocation8]   ;;  %s1454_s11 = scalar_lea.hbm %s1921_s1, 1536 }
  0x23   : > { %p1630_p9 = pnand %p1926_p8, %p1925_p6  ;;  %s193_s8 = sshll.u32 %s1547_s7, 4  ;;  %s194_s8 = int_to_ptr.vmem [resolvable:$true] %s193_s8 }
  0x24   : > { %p1455_p4 = scmp.ne.s32.totalorder %s1921_s1, %s1454_s11  ;;  %p1461_p11 = scmp.lt.u32.totalorder %s1454_s11, %s1921_s1 }
  0x25   : > { %s1927_s6 = scalar_select %p1630_p9, 1, 0 }
  0x26   : > { %p1457_p5 = pnand %p1455_p4, %p1428_p7 }
  0x28   : > { %p1458_p10 = pneg %p1457_p5 }
  0x2a   : > { %p1463_p12 = pnand %p1461_p11, %p1458_p10 }
  0x2c   : > { %1466 = shalt.err (!%p1463_p12)
}
  0x2d   : > { %s1467_s22 = scalar_lea.vmem %s194_s8, 1536  ;;  %s1474_s23 = scalar_lea.vmem %s194_s8, 3072 }
  0x2e   : > { %p1468_p13 = scmp.ne.s32.totalorder %s194_s8, %s1467_s22  ;;  %p1475_p2 = scmp.lt.s32.totalorder %s194_s8, %s194_s8 }
  0x2f   : > { %p1476_p6 = scmp.lt.s32.totalorder %s1474_s23, %s1467_s22 }
  0x30   : > { %p1470_p0 = pnand %p1468_p13, %p1428_p7 }
  0x31   : > { %p1477_p8 = por %p1476_p6, %p1475_p2 }
  0x32   : > { %p1471_p1 = pneg %p1470_p0 }
  0x34   : > { %p1478_p9 = pnand %p1477_p8, %p1471_p1 }
  0x36   : > { %1481 = shalt.err (!%p1478_p9)
}
  0x37   : > { %1359 = dma.hbm_to_vmem [thread:$0]  (!%p1598_p3), %s1921_s1, 1536, %s194_s8, [#allocation9], %s1545_s29, %s1545_s29, %s1546_s30  }
  0x38   : > { %p1928_p4 = scmp.ne.s32.totalorder %s1927_s6, 0 }
  0x39   : > { %p1363_p5 = scmp.eq.s32.totalorder (!%p1928_p4), %s1207_s15, 0 }
  0x3a   : > { %205 = sbr.rel (%p1928_p4) target bundleno = 1450 (0x5aa), region = 32 }
  0x41   : > { %1521 = dma.done.wait (%p1363_p5), [#allocation6], 1536  }
  0x42   : > { %1523 = vsyncadd (%p1363_p5), [#allocation6], 4294965760 }
  0x43   : > { %1525 = dma.done.wait (%p1363_p5), [#allocation9], 1536  }
  0x44   : > { %1527 = vsyncadd (%p1363_p5), [#allocation9], 4294965760  ;;  %v249_v0 = vlaneseq  ;;  %p256_p7 = scmp.eq.s32.totalorder %s1534_s12, 0 }
  0x45   : > { %vm272_vm8 = vcmask (%p256_p7), 57344   ;;  %v1548_v4 = vmov (%p256_p7), 0.0  }
  0x46   : > { %v1659_v1 = vshrl.u32 %v249_v0, 7  ;;  %261 = sbr.rel (!%p256_p7) target bundleno = 78 (0x4e), region = 44  ;;  %v263_v3 = vand.u32 (%p256_p7), 127, %v249_v0 }
  0x48   : > { %v1662_v2 = vadd.s32 8, %v1659_v1  ;;  %vm254_vm0 = vcmp.gt.s32.totalorder %v1659_v1, 0  ;;  %vm264_vm2 = vcmp.eq.s32.totalorder (%p256_p7), %v263_v3, 0  ;;  %vm265_vm3 = vcmp.eq.s32.totalorder (%p256_p7), %v263_v3, 2 }
  0x49   : > { %vm267_vm4 = vcmp.eq.s32.totalorder (%p256_p7), %v263_v3, 1  ;;  %vm268_vm5 = vcmp.eq.s32.totalorder (%p256_p7), %v263_v3, 3  ;;  %vm266_vm6 = vmor (%p256_p7), %vm264_vm2, %vm265_vm3 }
  0x4a   : > { %vm253_vm1 = vcmp.lt.s32.totalorder %v1662_v2, 15  ;;  %vm269_vm7 = vmor (%p256_p7), %vm267_vm4, %vm268_vm5 }
  0x4b   : > { %v270_v5 = vsel (%p256_p7), %vm269_vm7, -3.4028235e+38, %v1548_v4 }
  0x4c   : > { %v271_v6 = vsel (%p256_p7), %vm266_vm6, 3.4028235e+38, %v270_v5 }
  0x4d   : > { %273 = vst.msk [vmem:[#allocation2] sm:$0x1] %vm272_vm8, %v271_v6 }
  0x4e PF: > { %p1216_p3 = scmp.ne.s32.totalorder %s1534_s12, 0 }
  0x4f   : > { %v311_v7 = vld [vmem:[%s1922_s2] sm:$0xff] (!%p1216_p3)  ;;  %v312_v8 = vld [vmem:[%s1922_s2 + $0x8] sm:$0xff] (!%p1216_p3)  ;;  %v1217_v12 = vld [vmem:[#allocation5 + $0x10] sm:$0xff] (!%p1216_p3)  ;;  %vm313_vm9 = vcmask (!%p1216_p3), 130048   ;;  %vm297_vm10 = vcmp.lt.s32.totalorder (!%p1216_p3), %v1659_v1, 7  ;;  %vm302_vm11 = vcmp.lt.s32.totalorder (!%p1216_p3), %v1659_v1, 1 }
  0x50   : > { %276 = sbr.rel (%p1216_p3) target bundleno = 577 (0x241), region = 48  ;;  %v277_v9 = vld [vmem:[#allocation5] sm:$0xff] (!%p1216_p3)  ;;  %v1673_v10 = vpack.c.bf16 (!%p1216_p3), %v312_v8, %v311_v7  ;;  %v284_v15 = vmul.f32 (!%p1216_p3), 0.50412893, %v1217_v12  ;;  %v1223_v18 = vld [vmem:[#allocation8 + $0x10] sm:$0xff] (!%p1216_p3)  ;;  %v278_v20 = vld [vmem:[#allocation5 + $0x8] sm:$0xff] (!%p1216_p3) }
  0x51   : > { %v279_v11 = vmul.f32 (!%p1216_p3), 0.25678906, %v277_v9  ;;  %v1219_v13 = vld [vmem:[#allocation5 + $0x20] sm:$0xff] (!%p1216_p3)  ;;  %v424_v22 = vmul.f32 (!%p1216_p3), 0.50412893, %v1223_v18  ;;  %v1218_v25 = vld [vmem:[#allocation5 + $0x18] sm:$0xff] (!%p1216_p3) }
  0x52   : > { %v417_v14 = vld [vmem:[#allocation8] sm:$0xff] (!%p1216_p3)  ;;  %v291_v16 = vmul.f32 (!%p1216_p3), 0.09790625, %v1219_v13  ;;  %1306 = vmatprep.subr.bf16.mxu0 (!%p1216_p3), %v1673_v10  ;;  %1310 = vmatprep.subr.bf16.mxu1 (!%p1216_p3), %v1673_v10  ;;  %v280_v24 = vmul.f32 (!%p1216_p3), 0.25678906, %v278_v20  ;;  %v1220_v26 = vld [vmem:[#allocation5 + $0x28] sm:$0xff] (!%p1216_p3) }
  0x53   : > { %v419_v17 = vmul.f32 (!%p1216_p3), 0.25678906, %v417_v14  ;;  %v1225_v19 = vld [vmem:[#allocation8 + $0x20] sm:$0xff] (!%p1216_p3)  ;;  %1308 = vmatpush3.bf16.msra.mxu0 (!%p1216_p3), %v1673_v10  ;;  %1312 = vmatpush3.bf16.msra.mxu1 (!%p1216_p3), %v1673_v10  ;;  %v286_v21 = vadd.f32 (!%p1216_p3), %v284_v15, %v279_v11  ;;  %v418_v27 = vld [vmem:[#allocation8 + $0x8] sm:$0xff] (!%p1216_p3)  ;;  %v285_v30 = vmul.f32 (!%p1216_p3), 0.50412893, %v1218_v25 }
  0x54   : > { %v431_v23 = vmul.f32 (!%p1216_p3), 0.09790625, %v1225_v19  ;;  %1314 = vmatprep.subr.bf16.mxu0 (!%p1216_p3), %v1673_v10  ;;  %1318 = vmatprep.subr.bf16.mxu1 (!%p1216_p3), %v1673_v10  ;;  %v292_v31 = vmul.f32 (!%p1216_p3), 0.09790625, %v1220_v26  ;;  %v1224_v32 = vld [vmem:[#allocation8 + $0x18] sm:$0xff] (!%p1216_p3)  ;;  %v1226_v33 = vld [vmem:[#allocation8 + $0x28] sm:$0xff] (!%p1216_p3) }
  0x55   : > { %v1681_v28 = vadd.f32 (!%p1216_p3), %v291_v16, %v286_v21  ;;  %v426_v29 = vadd.f32 (!%p1216_p3), %v424_v22, %v419_v17  ;;  %v420_v34 = vmul.f32 (!%p1216_p3), 0.25678906, %v418_v27  ;;  %v425_v35 = vmul.f32 (!%p1216_p3), 0.50412893, %v1224_v32  ;;  %v1229_v39 = vld [vmem:[#allocation5 + $0x30] sm:$0xff] (!%p1216_p3)  ;;  %v1231_v40 = vld [vmem:[#allocation5 + $0x40] sm:$0xff] (!%p1216_p3) }
  0x56   : > { %v432_v36 = vmul.f32 (!%p1216_p3), 0.09790625, %v1226_v33  ;;  %v287_v38 = vadd.f32 (!%p1216_p3), %v285_v30, %v280_v24  ;;  %v1233_v41 = vld [vmem:[#allocation5 + $0x50] sm:$0xff] (!%p1216_p3)  ;;  %v615_v43 = vmul.f32 (!%p1216_p3), 0.25678906, %v1229_v39  ;;  %v1230_v49 = vld [vmem:[#allocation5 + $0x38] sm:$0xff] (!%p1216_p3) }
  0x57   : > { %1281 = vmatprep.mubr.msk.f32.mxu0 %vm313_vm9, %v1681_v28  ;;  %v1685_v37 = vadd.f32 %v431_v23, %v426_v29  ;;  %v427_v42 = vadd.f32 %v425_v35, %v420_v34  ;;  %v620_v44 = vmul.f32 0.50412893, %v1231_v40  ;;  %v627_v45 = vmul.f32 0.09790625, %v1233_v41  ;;  %v1232_v50 = vld [vmem:[#allocation5 + $0x48] sm:$0xff]  ;;  %v1234_v51 = vld [vmem:[#allocation5 + $0x58] sm:$0xff] }
  0x58   : > { %v295_v46 = vrot.slane %v1681_v28, 1  ;;  %v300_v47 = vrot.slane %v1681_v28, 7  ;;  %v294_v48 = vadd.f32 %v292_v31, %v287_v38  ;;  %v616_v54 = vmul.f32 0.25678906, %v1230_v49  ;;  %v1237_v56 = vld [vmem:[#allocation8 + $0x30] sm:$0xff]  ;;  %v1239_v57 = vld [vmem:[#allocation8 + $0x40] sm:$0xff] }
  0x59   : > { %1288 = vmatprep.mubr.msk.f32.mxu1 %vm313_vm9, %v1685_v37  ;;  %v434_v52 = vadd.f32 %v432_v36, %v427_v42  ;;  %v622_v53 = vadd.f32 %v620_v44, %v615_v43  ;;  %v621_v55 = vmul.f32 0.50412893, %v1232_v50  ;;  %v628_v58 = vmul.f32 0.09790625, %v1234_v51  ;;  %v1241_v63 = vld [vmem:[#allocation8 + $0x50] sm:$0xff]  ;;  %v1238_v0 = vld [vmem:[#allocation8 + $0x38] sm:$0xff] }
  0x5a   : > { %1282 = vmatmul.mubr.msk.f32.vlgmr.msra.gmra.mrb[0].mxu0 %vm313_vm9, %v294_v48  ;;  %v753_v59 = vmul.f32 0.25678906, %v1237_v56  ;;  %v758_v60 = vmul.f32 0.50412893, %v1239_v57  ;;  %v1240_v3 = vld [vmem:[#allocation8 + $0x48] sm:$0xff]  ;;  %v296_v4 = vrot.slane %v294_v48, 1 }
  0x5b   : > { %1289 = vmatmul.mubr.msk.f32.vlgmr.msra.gmra.mrb[0].mxu1 %vm313_vm9, %v434_v52  ;;  %1316 = vmatpush3.bf16.msra.mxu0 %v1673_v10  ;;  %v629_v61 = vadd.f32 %v627_v45, %v622_v53  ;;  %v623_v62 = vadd.f32 %v621_v55, %v616_v54  ;;  %v301_v5 = vrot.slane %v294_v48, 7  ;;  %v765_v7 = vmul.f32 0.09790625, %v1241_v63  ;;  %v1242_v12 = vld [vmem:[#allocation8 + $0x58] sm:$0xff] }
  0x5c   : > { %1320 = vmatpush3.bf16.msra.mxu1 %v1673_v10  ;;  %v760_v6 = vadd.f32 %v758_v60, %v753_v59  ;;  %v754_v8 = vmul.f32 0.25678906, %v1238_v0  ;;  %v759_v9 = vmul.f32 0.50412893, %v1240_v3  ;;  %v299_v13 = vsel %vm297_vm10, %v296_v4, %v295_v46 }
  0x5d   : > { %1295 = vmatprep.mubr.msk.f32.mxu0 %vm313_vm9, %v629_v61  ;;  %v630_v11 = vadd.f32 %v628_v58, %v623_v62  ;;  %v303_v14 = vsel %vm302_vm11, %v300_v47, %v301_v5  ;;  %v766_v17 = vmul.f32 0.09790625, %v1242_v12  ;;  %v306_v10 = vsel %vm253_vm1, %v299_v13, 0.0 }
  0x5e   : > { %v767_v15 = vadd.f32 %v765_v7, %v760_v6  ;;  %v761_v16 = vadd.f32 %v759_v9, %v754_v8  ;;  %v310_v18 = vsub.f32 %v306_v10, %v303_v14  ;;  %v304_v20 = vsel %vm302_vm11, %v301_v5, %v300_v47 }
  0x5f   : > { %1296 = vmatmul.mubr.msk.f32.vlgmr.msra.gmra.mrb[2].mxu0 %vm313_vm9, %v630_v11  ;;  %v298_v21 = vsel %vm297_vm10, %v295_v46, %v296_v4  ;;  %v307_v22 = vsel %vm254_vm0, %v304_v20, 0.0  ;;  %v435_v24 = vrot.slane %v1685_v37, 1  ;;  %v439_v25 = vrot.slane %v1685_v37, 7 }
  0x60   : > { %1302 = vmatprep.mubr.msk.f32.mxu1 %vm313_vm9, %v767_v15  ;;  %v768_v19 = vadd.f32 %v766_v17, %v761_v16  ;;  %v309_v23 = vsub.f32 %v298_v21, %v307_v22  ;;  %v436_v26 = vrot.slane %v434_v52, 1  ;;  %v440_v27 = vrot.slane %v434_v52, 7 }
  0x61   : > { %v631_v30 = vrot.slane %v629_v61, 1  ;;  %v632_v31 = vrot.slane %v630_v11, 1  ;;  %v635_v32 = vrot.slane %v629_v61, 7  ;;  %v636_v33 = vrot.slane %v630_v11, 7 }
  0x62   : > { %1303 = vmatmul.mubr.msk.f32.vlgmr.msra.gmra.mrb[2].mxu1 %vm313_vm9, %v768_v19  ;;  %v438_v28 = vsel %vm297_vm10, %v436_v26, %v435_v24  ;;  %v442_v29 = vsel %vm302_vm11, %v440_v27, %v439_v25  ;;  %v769_v34 = vrot.slane %v767_v15, 1  ;;  %v770_v35 = vrot.slane %v768_v19, 1 }
  0x63   : > { %v441_v36 = vsel %vm302_vm11, %v439_v25, %v440_v27  ;;  %v444_v37 = vsel %vm253_vm1, %v438_v28, 0.0  ;;  %v437_v38 = vsel %vm297_vm10, %v435_v24, %v436_v26  ;;  %v445_v39 = vsel %vm254_vm0, %v442_v29, 0.0 }
  0x64   : > { %v634_v40 = vsel %vm297_vm10, %v632_v31, %v631_v30  ;;  %v773_v41 = vrot.slane %v767_v15, 7  ;;  %v774_v42 = vrot.slane %v768_v19, 7  ;;  %v638_v43 = vsel %vm302_vm11, %v636_v33, %v635_v32 }
  0x65   : > { %v448_v44 = vsub.f32 %v444_v37, %v441_v36  ;;  %v447_v45 = vsub.f32 %v437_v38, %v445_v39  ;;  %v772_v46 = vsel %vm297_vm10, %v770_v35, %v769_v34  ;;  %v637_v47 = vsel %vm302_vm11, %v635_v32, %v636_v33 }
  0x66   : > { %v640_v48 = vsel %vm253_vm1, %v634_v40, 0.0  ;;  %v633_v49 = vsel %vm297_vm10, %v631_v30, %v632_v31  ;;  %v641_v50 = vsel %vm254_vm0, %v638_v43, 0.0  ;;  %v776_v51 = vsel %vm302_vm11, %v774_v42, %v773_v41 }
  0x67   : > { %v396_v52 = vmul.f32 %v310_v18, %v310_v18  ;;  %v775_v53 = vsel %vm302_vm11, %v773_v41, %v774_v42  ;;  %v778_v54 = vsel %vm253_vm1, %v772_v46, 0.0  ;;  %v531_v56 = vmul.f32 %v448_v44, %v448_v44 }
  0x68   : > { %v395_v57 = vmul.f32 %v309_v23, %v309_v23  ;;  %v530_v58 = vmul.f32 %v447_v45, %v447_v45  ;;  %v644_v59 = vsub.f32 %v640_v48, %v637_v47  ;;  %v643_v63 = vsub.f32 %v633_v49, %v641_v50 }
  0x69   : > { %v771_v0 = vsel %vm297_vm10, %v769_v34, %v770_v35  ;;  %v779_v3 = vsel %vm254_vm0, %v776_v51, 0.0  ;;  %v782_v2 = vsub.f32 %v778_v54, %v775_v53 }
  0x6a   : > { %v729_v12 = vmul.f32 %v644_v59, %v644_v59  ;;  %v781_v13 = vsub.f32 %v771_v0, %v779_v3  ;;  %v728_v17 = vmul.f32 %v643_v63, %v643_v63 }
  0x6b   : > { %v865_v20 = vmul.f32 %v782_v2, %v782_v2 }
  0x6c   : > { %v864_v26 = vmul.f32 %v781_v13, %v781_v13 }
 0x12d   : > { %v1283_v55 = vpop.f32.mrb[0].mxu0 }
 0x12e   : > { %v398_v60 = vmul.f32 %v1283_v55, %v1283_v55  ;;  %v1290_v61 = vpop.f32.mrb[0].mxu1  ;;  %v386_v62 = vpop.f32.mrb[1].mxu0 }
 0x12f   : > { %v533_v4 = vmul.f32 %v1290_v61, %v1290_v61  ;;  %v397_v5 = vmul.f32 %v386_v62, %v386_v62  ;;  %v521_v6 = vpop.f32.mrb[1].mxu1 }
 0x130   : > { %v400_v7 = vadd.f32 %v398_v60, %v396_v52  ;;  %v532_v8 = vmul.f32 %v521_v6, %v521_v6 }
 0x131   : > { %v535_v9 = vadd.f32 %v533_v4, %v531_v56  ;;  %v399_v11 = vadd.f32 %v397_v5, %v395_v57 }
 0x132   : > { %v1751_v14 = vadd.f32 1e-06, %v400_v7  ;;  %v534_v15 = vadd.f32 %v532_v8, %v530_v58  ;;  %v1297_v16 = vpop.f32.mrb[2].mxu0 }
 0x133   : > { %v1753_v10 = vadd.f32 1e-06, %v535_v9  ;;  %v731_v18 = vmul.f32 %v1297_v16, %v1297_v16  ;;  %v719_v19 = vpop.f32.mrb[3].mxu0  ;;  %v1755_v21 = vadd.f32 1e-06, %v399_v11 }
 0x134   : > { %v1757_v22 = vadd.f32 1e-06, %v534_v15  ;;  %v730_v23 = vmul.f32 %v719_v19, %v719_v19  ;;  %1404 = vrsqrt.f32 %v1751_v14  ;;  %vm412_vm14 = vcmp.eq.f32.partialorder %v1751_v14, inf }
 0x135   : > { %v733_v24 = vadd.f32 %v731_v18, %v729_v12  ;;  %v1304_v25 = vpop.f32.mrb[2].mxu1  ;;  %1406 = vrsqrt.f32 %v1753_v10  ;;  %vm547_vm12 = vcmp.eq.f32.partialorder %v1753_v10, inf  ;;  %vm549_vm13 = vcmp.eq.f32.partialorder %v1753_v10, 0.0 }
 0x136   : > { %v732_v27 = vadd.f32 %v730_v23, %v728_v17  ;;  %v867_v28 = vmul.f32 %v1304_v25, %v1304_v25  ;;  %v855_v29 = vpop.f32.mrb[3].mxu1  ;;  %1408 = vrsqrt.f32 %v1757_v22  ;;  %vm540_vm15 = vcmp.eq.f32.partialorder %v1757_v22, inf }
 0x137   : > { %v1762_v30 = vadd.f32 1e-06, %v733_v24  ;;  %v866_v31 = vmul.f32 %v855_v29, %v855_v29  ;;  %1410 = vrsqrt.f32 %v1755_v21  ;;  %vm542_vm0 = vcmp.eq.f32.partialorder %v1757_v22, 0.0 }
 0x138   : > { %v1764_v32 = vadd.f32 1e-06, %v732_v27  ;;  %v869_v33 = vadd.f32 %v867_v28, %v865_v20  ;;  %v543_v37 = vand.u32 2147483648, %v1757_v22  ;;  %v550_v38 = vand.u32 2147483648, %v1753_v10 }
 0x139   : > { %1412 = vrsqrt.f32 %v1762_v30  ;;  %v868_v34 = vadd.f32 %v866_v31, %v864_v26  ;;  %vm405_vm1 = vcmp.eq.f32.partialorder %v1755_v21, inf  ;;  %vm407_vm2 = vcmp.eq.f32.partialorder %v1755_v21, 0.0 }
 0x13a   : > { %1414 = vrsqrt.f32 %v1764_v32  ;;  %v1769_v35 = vadd.f32 1e-06, %v869_v33  ;;  %v408_v40 = vand.u32 2147483648, %v1755_v21  ;;  %vm414_vm3 = vcmp.eq.f32.partialorder %v1751_v14, 0.0 }
 0x13b   : > { %v1771_v36 = vadd.f32 1e-06, %v868_v34  ;;  %v415_v41 = vand.u32 2147483648, %v1751_v14  ;;  %vm738_vm4 = vcmp.eq.f32.partialorder %v1764_v32, inf  ;;  %vm740_vm5 = vcmp.eq.f32.partialorder %v1764_v32, 0.0 }
 0x13c   : > { %1416 = vrsqrt.f32 %v1769_v35  ;;  %v741_v44 = vand.u32 2147483648, %v1764_v32  ;;  %vm745_vm6 = vcmp.eq.f32.partialorder %v1762_v30, inf  ;;  %vm747_vm7 = vcmp.eq.f32.partialorder %v1762_v30, 0.0 }
 0x13d   : > { %1418 = vrsqrt.f32 %v1771_v36  ;;  %v748_v47 = vand.u32 2147483648, %v1762_v30  ;;  %vm876_vm10 = vcmp.eq.f32.partialorder %v1771_v36, 0.0  ;;  %v877_v50 = vand.u32 2147483648, %v1771_v36 }
 0x13e   : > { %v1405_v39 = vpop.eup %1404  ;;  %vm881_vm11 = vcmp.eq.f32.partialorder %v1769_v35, inf  ;;  %vm883_vm8 = vcmp.eq.f32.partialorder %v1769_v35, 0.0  ;;  %v884_v54 = vand.u32 2147483648, %v1769_v35 }
 0x13f   : > { %v1407_v42 = vpop.eup %1406  ;;  %v411_v43 = vmul.f32 %v1405_v39, %v1751_v14 }
 0x140   : > { %v1409_v45 = vpop.eup %1408  ;;  %v546_v46 = vmul.f32 %v1407_v42, %v1753_v10 }
 0x141   : > { %v539_v48 = vmul.f32 %v1409_v45, %v1757_v22  ;;  %v413_v49 = vsel %vm412_vm14, %v1751_v14, %v411_v43  ;;  %v1411_v51 = vpop.eup %1410  ;;  %vm960_vm14 = vcmask 16400  }
 0x142   : > { %v548_v52 = vsel %vm547_vm12, %v1753_v10, %v546_v46  ;;  %v416_v53 = vsel %vm414_vm3, %v415_v41, %v413_v49  ;;  %v404_v58 = vmul.f32 %v1411_v51, %v1755_v21  ;;  %vm1929_vm12 = vcmp.eq.f32.partialorder %v1771_v36, inf }
 0x143   : > { %v1413_v55 = vpop.eup %1412  ;;  %v541_v56 = vsel %vm540_vm15, %v1757_v22, %v539_v48  ;;  %v551_v57 = vsel %vm549_vm13, %v550_v38, %v548_v52  ;;  %556 = vst.msk [vmem:[#allocation3 + $0x8] sm:$0xff] %vm313_vm9, %v416_v53  ;;  %v561_v59 = vsel %vm313_vm9, %v416_v53, inf  ;;  %v574_v0 = vsel %vm313_vm9, %v416_v53, -inf }
 0x144   : > { %v1415_v60 = vpop.eup %1414  ;;  %v544_v61 = vsel %vm542_vm0, %v543_v37, %v541_v56  ;;  %559 = vst.msk [vmem:[#allocation4 + $0x8] sm:$0xff] %vm313_vm9, %v551_v57  ;;  %v587_v62 = vsel %vm313_vm9, %v551_v57, inf  ;;  %v600_v63 = vsel %vm313_vm9, %v551_v57, -inf  ;;  %v406_v4 = vsel %vm405_vm1, %v1755_v21, %v404_v58 }
 0x145   : > { %v586_v3 = vsel %vm313_vm9, %v544_v61, inf  ;;  %558 = vst.msk [vmem:[#allocation4] sm:$0xff] %vm313_vm9, %v544_v61  ;;  %v599_v5 = vsel %vm313_vm9, %v544_v61, -inf  ;;  %v737_v6 = vmul.f32 %v1415_v60, %v1764_v32  ;;  %v409_v8 = vsel %vm407_vm2, %v408_v40, %v406_v4 }
 0x146   : > { %v1417_v2 = vpop.eup %1416  ;;  %v588_v7 = vmin.f32 %v586_v3, %v587_v62  ;;  %v601_v9 = vmax.f32 %v599_v5, %v600_v63  ;;  %v744_v11 = vmul.f32 %v1413_v55, %v1762_v30  ;;  %v560_v13 = vsel %vm313_vm9, %v409_v8, inf  ;;  %555 = vst.msk [vmem:[#allocation3] sm:$0xff] %vm313_vm9, %v409_v8 }
 0x147   : > { %v1419_v12 = vpop.eup %1418  ;;  %v573_v14 = vsel %vm313_vm9, %v409_v8, -inf  ;;  %v739_v15 = vsel %vm738_vm4, %v1764_v32, %v737_v6  ;;  %v880_v16 = vmul.f32 %v1417_v2, %v1769_v35  ;;  %v562_v17 = vmin.f32 %v560_v13, %v561_v59 }
 0x148   : > { %589 = vmin.xlane.f32.xlu1 %v588_v7  ;;  %v575_v10 = vmax.f32 %v573_v14, %v574_v0  ;;  %v742_v18 = vsel %vm740_vm5, %v741_v44, %v739_v15  ;;  %v746_v19 = vsel %vm745_vm6, %v1762_v30, %v744_v11  ;;  %v873_v23 = vmul.f32 %v1419_v12, %v1771_v36 }
 0x149   : > { %v749_v20 = vsel %vm747_vm7, %v748_v47, %v746_v19  ;;  %v907_v21 = vsel %vm313_vm9, %v742_v18, -inf  ;;  %1245 = vst.msk [vmem:[#allocation3 + $0x10] sm:$0xff] %vm313_vm9, %v742_v18  ;;  %v894_v22 = vsel %vm313_vm9, %v742_v18, inf  ;;  %563 = vmin.xlane.f32.xlu0 %v562_v17  ;;  %v882_v26 = vsel %vm881_vm11, %v1769_v35, %v880_v16 }
 0x14a   : > { %1246 = vst.msk [vmem:[#allocation3 + $0x18] sm:$0xff] %vm313_vm9, %v749_v20  ;;  %v908_v24 = vsel %vm313_vm9, %v749_v20, -inf  ;;  %v895_v25 = vsel %vm313_vm9, %v749_v20, inf  ;;  %v875_v29 = vsel %vm1929_vm12, %v1771_v36, %v873_v23  ;;  %v885_v30 = vsel %vm883_vm8, %v884_v54, %v882_v26 }
 0x14b   : > { %v909_v27 = vmax.f32 %v907_v21, %v908_v24  ;;  %v896_v28 = vmin.f32 %v894_v22, %v895_v25  ;;  %v878_v31 = vsel %vm876_vm10, %v877_v50, %v875_v29  ;;  %1248 = vst.msk [vmem:[#allocation4 + $0x18] sm:$0xff] %vm313_vm9, %v885_v30  ;;  %v934_v32 = vsel %vm313_vm9, %v885_v30, -inf }
 0x14c   : > { %602 = vmax.xlane.f32.xlu1 %v601_v9  ;;  %v921_v33 = vsel %vm313_vm9, %v885_v30, inf  ;;  %1247 = vst.msk [vmem:[#allocation4 + $0x10] sm:$0xff] %vm313_vm9, %v878_v31  ;;  %v933_v34 = vsel %vm313_vm9, %v878_v31, -inf  ;;  %v920_v37 = vsel %vm313_vm9, %v878_v31, inf  ;;  %vm952_vm9 = vcmask 0  }
 0x14d   : > { %576 = vmax.xlane.f32.xlu0 %v575_v10  ;;  %v935_v38 = vmax.f32 %v933_v34, %v934_v32  ;;  %v922_v35 = vmin.f32 %v920_v37, %v921_v33  ;;  %v950_v33 = vld [vmem:[#allocation2] sm:$0x1]  ;;  %vm956_vm13 = vcmask 8200   ;;  %vm964_vm15 = vcmask 24600  }
 0x150   : > { %910 = vmax.xlane.f32.xlu1 %v909_v27 }
 0x151   : > { %897 = vmin.xlane.f32.xlu0 %v896_v28 }
 0x154   : > { %936 = vmax.xlane.f32.xlu1 %v935_v38 }
 0x155   : > { %923 = vmin.xlane.f32.xlu0 %v922_v35 }
 0x1d5   : > { %v590_v36 = vpop.xlane.xlu1 %589 }
 0x1d6   : > { %v591_v39 = vrot.slane %v590_v36, 4  ;;  %v564_v40 = vpop.xlane.xlu0 %563 }
 0x1d7   : > { %v565_v42 = vrot.slane %v564_v40, 4 }
 0x1d8   : > { %v592_v41 = vmin.f32 %v590_v36, %v591_v39 }
 0x1d9   : > { %v603_v43 = vpop.xlane.xlu1 %602  ;;  %v566_v44 = vmin.f32 %v564_v40, %v565_v42 }
 0x1da   : > { %v604_v45 = vrot.slane %v603_v43, 4  ;;  %v593_v46 = vrot.slane %v592_v41, 2  ;;  %v577_v47 = vpop.xlane.xlu0 %576 }
 0x1db   : > { %v567_v48 = vrot.slane %v566_v44, 2  ;;  %v578_v50 = vrot.slane %v577_v47, 4 }
 0x1dc   : > { %v605_v49 = vmax.f32 %v603_v43, %v604_v45  ;;  %v594_v57 = vmin.f32 %v592_v41, %v593_v46 }
 0x1dd   : > { %v911_v51 = vpop.xlane.xlu1 %910  ;;  %v579_v53 = vmax.f32 %v577_v47, %v578_v50  ;;  %v568_v55 = vmin.f32 %v566_v44, %v567_v48 }
 0x1de   : > { %v606_v52 = vrot.slane %v605_v49, 2  ;;  %v912_v54 = vrot.slane %v911_v51, 4  ;;  %v898_v56 = vpop.xlane.xlu0 %897  ;;  %v595_v7 = vrot.slane %v594_v57, 1 }
 0x1df   : > { %v580_v58 = vrot.slane %v579_v53, 2  ;;  %v899_v60 = vrot.slane %v898_v56, 4  ;;  %v569_v61 = vrot.slane %v568_v55, 1 }
 0x1e0   : > { %v913_v59 = vmax.f32 %v911_v51, %v912_v54  ;;  %v607_v63 = vmax.f32 %v605_v49, %v606_v52  ;;  %v596_v22 = vmin.f32 %v594_v57, %v595_v7 }
 0x1e1   : > { %v937_v62 = vpop.xlane.xlu1 %936  ;;  %v900_v3 = vmin.f32 %v898_v56, %v899_v60  ;;  %v570_v5 = vmin.f32 %v568_v55, %v569_v61  ;;  %v581_v2 = vmax.f32 %v579_v53, %v580_v58 }
 0x1e2   : > { %v914_v0 = vrot.slane %v913_v59, 2  ;;  %v938_v4 = vrot.slane %v937_v62, 4  ;;  %v924_v6 = vpop.xlane.xlu0 %923  ;;  %v608_v8 = vrot.slane %v607_v63, 1 }
 0x1e3   : > { %v901_v9 = vrot.slane %v900_v3, 2  ;;  %v925_v12 = vrot.slane %v924_v6, 4  ;;  %1321 = vpush %v570_v5  ;;  %v582_v14 = vrot.slane %v581_v2, 1 }
 0x1e4   : > { %v939_v11 = vmax.f32 %v937_v62, %v938_v4  ;;  %v915_v13 = vmax.f32 %v913_v59, %v914_v0  ;;  %v609_v19 = vmax.f32 %v607_v63, %v608_v8 }
 0x1e5   : > { %v926_v16 = vmin.f32 %v924_v6, %v925_v12  ;;  %v902_v17 = vmin.f32 %v900_v3, %v901_v9  ;;  %v583_v18 = vmax.f32 %v581_v2, %v582_v14 }
 0x1e6   : > { %v940_v15 = vrot.slane %v939_v11, 2  ;;  %v916_v10 = vrot.slane %v915_v13, 1 }
 0x1e7   : > { %v927_v21 = vrot.slane %v926_v16, 2  ;;  %v903_v23 = vrot.slane %v902_v17, 1  ;;  %1323 = vpush %v583_v18 }
 0x1e8   : > { %v941_v20 = vmax.f32 %v939_v11, %v940_v15  ;;  %v917_v24 = vmax.f32 %v915_v13, %v916_v10  ;;  %1325 = vpush %v596_v22 }
 0x1e9   : > { %v928_v25 = vmin.f32 %v926_v16, %v927_v21  ;;  %v904_v26 = vmin.f32 %v902_v17, %v903_v23  ;;  %1327 = vpush %v609_v19 }
 0x1ea   : > { %v942_v27 = vrot.slane %v941_v20, 1 }
 0x1eb   : > { %1329 = vpush %v904_v26  ;;  %v929_v28 = vrot.slane %v928_v25, 1 }
 0x1ec   : > { %1331 = vpush %v917_v24  ;;  %v943_v29 = vmax.f32 %v941_v20, %v942_v27 }
 0x1ed   : > { %v930_v30 = vmin.f32 %v928_v25, %v929_v28 }
 0x1ef   : > { %1333 = vpush %v930_v30 }
 0x1f0   : > { %1335 = vpush %v943_v29 }
 0x214   : > { %s1322_s29 = spop %1321 }
 0x215   : > { %v572_v31 = vstv %s1322_s29 }
 0x218   : > { %s1324_s30 = spop %1323 }
 0x219   : > { %s1326_s4 = spop %1325  ;;  %v585_v35 = vstv %s1324_s30 }
 0x21a   : > { %s1328_s5 = spop %1327  ;;  %v598_v42 = vstv %s1326_s4 }
 0x21b   : > { %v611_v47 = vstv %s1328_s5 }
 0x21c   : > { %s1330_s6 = spop %1329 }
 0x21d   : > { %v906_v32 = vstv %s1330_s6  ;;  %s1332_s7 = spop %1331 }
 0x21e   : > { %v946_v34 = vmin.f32 %v572_v31, %v906_v32  ;;  %v919_v38 = vstv %s1332_s7 }
 0x21f   : > { %v947_v36 = vmax.f32 %v585_v35, %v919_v38 }
 0x220   : > { %v951_v37 = vmin.f32 %v950_v33, %v946_v34  ;;  %s1334_s8 = spop %1333 }
 0x221   : > { %v932_v41 = vstv %s1334_s8  ;;  %s1336_s9 = spop %1335 }
 0x222   : > { %953 = vst.msk [vmem:[#allocation2] sm:$0x1] %vm952_vm9, %v951_v37  ;;  %v948_v43 = vmin.f32 %v598_v42, %v932_v41  ;;  %v945_v46 = vstv %s1336_s9 }
 0x223   : > { %v949_v48 = vmax.f32 %v611_v47, %v945_v46 }
 0x229   : > { %v954_v39 = vld [vmem:[#allocation2] sm:$0x1] }
 0x22a   : > { %v955_v40 = vmax.f32 %v954_v39, %v947_v36 }
 0x22c   : > { %957 = vst.msk [vmem:[#allocation2] sm:$0x1] %vm956_vm13, %v955_v40 }
 0x233   : > { %v958_v44 = vld [vmem:[#allocation2] sm:$0x1] }
 0x234   : > { %v959_v45 = vmin.f32 %v958_v44, %v948_v43 }
 0x236   : > { %961 = vst.msk [vmem:[#allocation2] sm:$0x1] %vm960_vm14, %v959_v45 }
 0x23d   : > { %v962_v49 = vld [vmem:[#allocation2] sm:$0x1] }
 0x23e   : > { %v963_v50 = vmax.f32 %v962_v49, %v949_v48 }
 0x240   : > { %965 = vst.msk [vmem:[#allocation2] sm:$0x1] %vm964_vm15, %v963_v50 }
 0x241 PF: > { %p966_p9 = scmp.eq.s32.totalorder %s1534_s12, 1  ;;  %p1249_p10 = scmp.ne.s32.totalorder %s1534_s12, 1 }
 0x242   : > { %s1549_s10 = smov (!%p1249_p10), 1   ;;  %v1550_v52 = vmov (!%p1249_p10), 3   ;;  %v1551_v56 = vmov (!%p1249_p10), 1   ;;  %v999_v59 = vsub.s32 (!%p1249_p10), 0, %v1659_v1  ;;  %s1552_s11 = smov (!%p1249_p10), 127   ;;  %v1553_v61 = vmov (!%p1249_p10), 2  }
 0x243   : > { %969 = sbr.rel (%p1249_p10) target bundleno = 1298 (0x512), region = 52  ;;  %1421 = vset.pattern.permute.xlu0 (!%p1249_p10), %v1550_v52  ;;  %1420 = vset.pattern.permute.xlu1 (!%p1249_p10), %v1551_v56  ;;  %s1554_s17 = smov (!%p1249_p10), 2   ;;  %v992_v5 = vld [vmem:[#allocation3] sm:$0xff] (!%p1249_p10)  ;;  %v993_v6 = vld [vmem:[#allocation3 + $0x8] sm:$0xff] (!%p1249_p10)  ;;  %v1250_v2 = vld [vmem:[#allocation3 + $0x10] sm:$0xff] (!%p1249_p10)  ;;  %vm1028_vm0 = vcmask (!%p1249_p10), 130048  }
 0x244   : > { %v1251_v7 = vld [vmem:[#allocation3 + $0x18] sm:$0xff] (!%p1249_p10)  ;;  %v995_v9 = vld [vmem:[#allocation4] sm:$0xff] (!%p1249_p10)  ;;  %v996_v11 = vld [vmem:[#allocation4 + $0x8] sm:$0xff] (!%p1249_p10)  ;;  %vm1076_vm1 = vcmask (!%p1249_p10), 32800  }
 0x245   : > { %v1252_v12 = vld [vmem:[#allocation4 + $0x10] sm:$0xff] (!%p1249_p10)  ;;  %v1253_v13 = vld [vmem:[#allocation4 + $0x18] sm:$0xff] (!%p1249_p10) }
 0x247   : > { %v1873_v51 = vld [vmem:[#allocation2] sm:$0x1] (!%p1249_p10) }
 0x248   : > { %972 = vrot.lane.b32.xlu0 (!%p1249_p10), %v1873_v51, %s1549_s10 }
 0x2ba   : > { %v973_v53 = vpop.permute.xlu0 %972 }
 0x2bb   : > { %v975_v54 = vsub.f32 %v1873_v51, %v973_v53 }
 0x2bd   : > { %v976_v55 = vadd.f32 1e-06, %v975_v54 }
 0x2bf   : > { %1424 = vrcp.f32 %v976_v55 }
 0x2c9   : > { %v1425_v57 = vpop.eup %1424 }
 0x2ca   : > { %v978_v58 = vmul.f32 2.0, %v1425_v57 }
 0x2cc   : > { %980 = vrot.lane.b32.xlu0 %v978_v58, %s1552_s11  ;;  %v1000_v60 = vrot.slane %v978_v58, %v999_v59 }
 0x2d0   : > { %1008 = vperm.xlu0 %1421, %v1000_v60  }
 0x2d4   : > { %1423 = vset.pattern.permute.xlu0 %v1553_v61 }
 0x33e   : > { %v981_v62 = vpop.permute.xlu0 %980 }
 0x33f   : > { %v983_v63 = vmul.f32 %v981_v62, %v1873_v51 }
 0x341   : > { %985 = vrot.lane.b32.xlu1 %v983_v63, %s1554_s17 }
 0x345   : > { %1002 = vperm.xlu1 %1420, %v1000_v60  }
 0x349   : > { %1422 = vset.pattern.permute.xlu1 %v1553_v61 }
 0x34f   : > { %v1009_v14 = vpop.permute.xlu0 %1008 }
 0x350   : > { %v1011_v18 = vmul.f32 %v1009_v14, %v995_v9  ;;  %v1012_v19 = vmul.f32 %v1009_v14, %v996_v11  ;;  %v1053_v20 = vmul.f32 %v1252_v12, %v1009_v14  ;;  %v1054_v21 = vmul.f32 %v1253_v13, %v1009_v14 }
 0x3b3   : > { %v986_v0 = vpop.permute.xlu1 %985 }
 0x3b4   : > { %v988_v3 = vsub.f32 %v983_v63, %v986_v0 }
 0x3b6   : > { %v1019_v4 = vrot.slane %v988_v3, %v999_v59 }
 0x3b8   : > { %1021 = vperm.xlu1 %1422, %v1019_v4  }
 0x3c4   : > { %v1003_v8 = vpop.permute.xlu1 %1002 }
 0x3c5   : > { %v1005_v15 = vmul.f32 %v1003_v8, %v992_v5  ;;  %v1006_v16 = vmul.f32 %v1003_v8, %v993_v6  ;;  %v1051_v17 = vmul.f32 %v1250_v2, %v1003_v8  ;;  %v1052_v10 = vmul.f32 %v1251_v7, %v1003_v8 }
 0x3c7   : > { %v1013_v22 = vsub.f32 %v1005_v15, %v1011_v18  ;;  %v1014_v23 = vsub.f32 %v1006_v16, %v1012_v19  ;;  %v1055_v24 = vsub.f32 %v1051_v17, %v1053_v20  ;;  %v1056_v25 = vsub.f32 %v1052_v10, %v1054_v21 }
 0x437   : > { %v1022_v26 = vpop.permute.xlu1 %1021 }
 0x438   : > { %v1024_v27 = vadd.f32 %v1022_v26, %v1013_v22  ;;  %v1025_v28 = vadd.f32 %v1022_v26, %v1014_v23  ;;  %v1057_v29 = vadd.f32 %v1055_v24, %v1022_v26  ;;  %v1058_v30 = vadd.f32 %v1056_v25, %v1022_v26 }
 0x43a   : > { %v1026_v31 = vand.u32 2147483647, %v1024_v27  ;;  %v1027_v32 = vand.u32 2147483647, %v1025_v28  ;;  %v1059_v33 = vand.u32 2147483647, %v1057_v29 }
 0x43b   : > { %v1060_v34 = vand.u32 2147483647, %v1058_v30 }
 0x43c   : > { %v1029_v37 = vsel %vm1028_vm0, %v1026_v31, 0.0  ;;  %v1030_v38 = vsel %vm1028_vm0, %v1027_v32, 0.0  ;;  %v1061_v35 = vsel %vm1028_vm0, %v1059_v33, 0.0 }
 0x43d   : > { %v1031_v36 = vadd.f32 %v1030_v38, %v1029_v37  ;;  %v1062_v39 = vsel %vm1028_vm0, %v1060_v34, 0.0 }
 0x43e   : > { %v1063_v40 = vadd.f32 %v1062_v39, %v1061_v35 }
 0x43f   : > { %1032 = vadd.xlane.f32.xlu1 %v1031_v36 }
 0x440   : > { %1064 = vadd.xlane.f32.xlu0 %v1063_v40 }
 0x4cc   : > { %v1033_v41 = vpop.xlane.xlu1 %1032 }
 0x4cd   : > { %v1034_v42 = vrot.slane %v1033_v41, 4  ;;  %v1065_v43 = vpop.xlane.xlu0 %1064 }
 0x4ce   : > { %v1066_v44 = vrot.slane %v1065_v43, 4 }
 0x4cf   : > { %v1035_v45 = vadd.f32 %v1034_v42, %v1033_v41 }
 0x4d0   : > { %v1067_v46 = vadd.f32 %v1066_v44, %v1065_v43 }
 0x4d1   : > { %v1036_v47 = vrot.slane %v1035_v45, 2 }
 0x4d2   : > { %v1068_v48 = vrot.slane %v1067_v46, 2 }
 0x4d3   : > { %v1037_v49 = vadd.f32 %v1036_v47, %v1035_v45 }
 0x4d4   : > { %v1069_v50 = vadd.f32 %v1068_v48, %v1067_v46 }
 0x4d5   : > { %v1038_v52 = vrot.slane %v1037_v49, 1 }
 0x4d6   : > { %v1070_v53 = vrot.slane %v1069_v50, 1 }
 0x4d7   : > { %v1039_v54 = vadd.f32 %v1038_v52, %v1037_v49 }
 0x4d8   : > { %v1071_v55 = vadd.f32 %v1070_v53, %v1069_v50 }
 0x4d9   : > { %1337 = vpush %v1039_v54 }
 0x4da   : > { %1339 = vpush %v1071_v55 }
 0x50a   : > { %s1338_s20 = spop %1337 }
 0x50b   : > { %v1041_v56 = vstv %s1338_s20  ;;  %s1340_s18 = spop %1339 }
 0x50c   : > { %v1073_v57 = vstv %s1340_s18 }
 0x50d   : > { %v1074_v58 = vadd.f32 %v1073_v57, %v1041_v56 }
 0x50f   : > { %v1075_v59 = vadd.f32 %v1074_v58, %v1873_v51 }
 0x511   : > { %1077 = vst.msk [vmem:[#allocation2] sm:$0x1] %vm1076_vm1, %v1075_v59 }
 0x512 PF: > { %1081 = sbr.rel (!%p966_p9) target bundleno = 1425 (0x591), region = 56  ;;  %v1087_v61 = vsub.s32 (%p966_p9), 0, %v1659_v1  ;;  %s1555_s21 = smov (%p966_p9), 124   ;;  %vm1092_vm2 = vcmask (%p966_p9), 0  }
 0x518   : > { %v1082_v60 = vld [vmem:[#allocation2] sm:$0x1] (%p966_p9) }
 0x519   : > { %v1083_v62 = vmul.f32 0.001953125, %v1082_v60 }
 0x51b   : > { %v1088_v63 = vrot.slane %v1083_v62, %v1087_v61 }
 0x51d   : > { %1089 = vrot.lane.b32.xlu0 %v1088_v63, %s1555_s21 }
 0x58f   : > { %v1090_v0 = vpop.permute.xlu0 %1089 }
 0x590   : > { %1093 = vst.msk [vmem:[#allocation10] sm:$0x1] %vm1092_vm2, %v1090_v0 }
 0x591 PF: > { %p1885_p11 = scmp.eq.s32.totalorder %s1207_s15, 1  ;;  %s1556_s12 = smov [#allocation10]  }
 0x592   : > { %s1101_s23 = sshll.u32 %s1556_s12, 4  ;;  %s1102_s23 = int_to_ptr.vmem [resolvable:$true] %s1101_s23 }
 0x593   : > { %s1482_s24 = scalar_lea.vmem %s1102_s23, 16  ;;  %s1488_s25 = scalar_lea.vmem %s1102_s23, 32 }
 0x594   : > { %p1483_p12 = scmp.ne.s32.totalorder %s1102_s23, %s1482_s24  ;;  %p1489_p1 = scmp.lt.s32.totalorder %s1102_s23, %s1102_s23 }
 0x595   : > { %p1490_p2 = scmp.lt.s32.totalorder %s1488_s25, %s1482_s24 }
 0x596   : > { %p1484_p13 = pnand %p1483_p12, %p1885_p11 }
 0x597   : > { %p1491_p6 = por %p1490_p2, %p1489_p1 }
 0x598   : > { %p1485_p0 = pneg %p1484_p13 }
 0x59a   : > { %p1492_p8 = pnand %p1491_p6, %p1485_p0 }
 0x59c   : > { %1495 = shalt.err (!%p1492_p8)
}
 0x59d   : > { %s1496_s26 = scalar_lea.hbm %s1923_s3, 16 }
 0x59e   : > { %p1497_p4 = scmp.ne.s32.totalorder %s1923_s3, %s1496_s26  ;;  %p1502_p3 = scmp.lt.u32.totalorder %s1496_s26, %s1923_s3 }
 0x5a0   : > { %p1498_p5 = pnand %p1497_p4, %p1885_p11 }
 0x5a2   : > { %p1499_p7 = pneg %p1498_p5 }
 0x5a4   : > { %p1504_p9 = pnand %p1502_p3, %p1499_p7 }
 0x5a6   : > { %1507 = shalt.err (!%p1504_p9)
}
 0x5a7   : > { %1350 = dma.vmem_to_hbm [thread:$0]  (%p1885_p11), %s1102_s23, 16, %s1923_s3, [#allocation7]  }
 0x5a8   : > { %1529 = dma.done.wait (%p1885_p11), [#allocation7], 16  }
 0x5a9   : > { %1531 = vsyncadd (%p1885_p11), [#allocation7], 4294967280 }
 0x5aa PF: > { %s20_s14 = sadd.s32 1, %s1542_s14   ;;  %s1931_s12 = smov %s1538_s13 }
 0x5ab   : > { %p17_p10 = scmp.ge.s32.totalorder %s20_s14, 4   ;;  %s1932_s13 = smov %s1934_s16 }
 0x5ad   :  { %19 = sbr.rel (!%p17_p10) target bundleno = 6 (0x6), region = 116 }
 0x5b4   :  { %1114 = vsyncpa [#allocation6], 1 }
 0x5b5   :  { %1116 = vsyncpa [#allocation6 + $0x1], 1 }
 0x5b6   :  { %1117 = vsyncpa [#allocation9], 1 }
 0x5b7   :  { %1119 = vsyncpa [#allocation9 + $0x1], 1 }
 0x5b8   :  { %1120 = vsyncpa [#allocation7], 1 }
 0x5b9   :  { %1122 = vsyncpa [#allocation7 + $0x1], 1 }

</bundles_post_ra>
